<compile_context>
chip_gen: v5e
topology: v5e:2x2
jax: 0.10.0
libtpu: 0.0.40
codegen_flags: <defaults>
</compile_context>

<pallas_src>
import jax
import jax.numpy as jnp
from jax.experimental import pallas as pl
from jax.experimental.pallas import tpu as pltpu

STATE_DIM = 15
ACTION_DIM = 3
D_IN = STATE_DIM + ACTION_DIM   # 18 (kept unpadded: full-dim BlockSpec)
H1 = 700
H2 = 500
OUT = 1

H1_P = 768     # 700 -> next multiple of 128
H2_P = 512     # 500 -> next multiple of 128

MAX_TB = 512   # max batch-tile rows per grid step


def _round_up(n, m):
    return ((n + m - 1) // m) * m


def _choose_tile(B):
    """Batch tile size (always a multiple of 16 for bf16 sublane packing).

    - B <= 128: one tile covering the whole (16-rounded) batch.
    - B  > 128: at least 2 grid steps (so the 'parallel' axis can shard across
      v7x's two TensorCores), at most MAX_TB rows per step, and the tile sized
      to the batch so padded-row waste stays small."""
    if B <= 128:
        return _round_up(B, 16)
    n_steps = max(2, -(-B // MAX_TB))
    return min(MAX_TB, _round_up(-(-B // n_steps), 16))


def critic_kernel(xu_ref, w1_ref, b1_ref, w2_ref, b2_ref, w3_ref, b3_ref, o_ref):
    # Layer 1: (TB, 18) bf16 @ (18, 768) bf16 -> f32 accumulate, +b1, ReLU.
    h1 = jnp.dot(xu_ref[...], w1_ref[...], preferred_element_type=jnp.float32)
    h1 = jnp.maximum(h1 + b1_ref[...], 0.0)

    # Layer 2: (TB, 768) bf16 @ (768, 512) bf16 -> f32 accumulate, +b2, ReLU.
    h2 = jnp.dot(h1.astype(jnp.bfloat16), w2_ref[...],
                 preferred_element_type=jnp.float32)
    h2 = jnp.maximum(h2 + b2_ref[...], 0.0)

    # Layer 3: lane reduce against the (1, 512) w3 row, f32 throughout, then
    # relayout the (TB, 1) column into a lane-dense (1, TB) row for the store.
    q = jnp.sum(h2 * w3_ref[...], axis=-1, keepdims=True) + b3_ref[0, 0]   # (TB, 1)
    o_ref[...] = jnp.transpose(q).astype(o_ref.dtype)                      # (1, TB)


@jax.jit
def critic_forward(x, u, padded_params):
    """x: (B, 15) f32, u: (B, 3) f32, padded_params: output of prepare_params.

    Returns q: (B, 1) f32."""
    w1_p, b1_p, w2_p, b2_p, w3_p, b3_p = padded_params
    B = x.shape[0]
    TB = _choose_tile(B)
    Bp = _round_up(B, TB)
    num_tiles = Bp // TB

    # (Bp, 18) bf16 input: concat + cast only; rows padded only when needed,
    # no column zero-fill/scatter (18 is the full last dim).
    xu = jnp.concatenate([x, u], axis=1).astype(jnp.bfloat16)
    if Bp != B:
        xu = jnp.pad(xu, ((0, Bp - B), (0, 0)))

    out_p = pl.pallas_call(
        critic_kernel,
        out_shape=jax.ShapeDtypeStruct((num_tiles, 1, TB), jnp.float32),
        grid=(num_tiles,),
        in_specs=[
            pl.BlockSpec((TB, D_IN), lambda i: (i, 0)),          # xu  (per batch tile)
            pl.BlockSpec((D_IN, H1_P), lambda i: (0, 0)),        # w1  (VMEM-resident)
            pl.BlockSpec((1, H1_P), lambda i: (0, 0)),           # b1
            pl.BlockSpec((H1_P, H2_P), lambda i: (0, 0)),        # w2  (VMEM-resident)
            pl.BlockSpec((1, H2_P), lambda i: (0, 0)),           # b2
            pl.BlockSpec((1, H2_P), lambda i: (0, 0)),           # w3 row
            pl.BlockSpec(memory_space=pltpu.MemorySpace.SMEM),   # b3 scalar in SMEM
        ],
        out_specs=pl.BlockSpec((None, 1, TB), lambda i: (i, 0, 0)),  # lane-dense rows
        compiler_params=pltpu.CompilerParams(
            dimension_semantics=("parallel",),
            vmem_limit_bytes=16 << 20,
        ),
    )(xu, w1_p, b1_p, w2_p, b2_p, w3_p, b3_p)

    return out_p.reshape(Bp, 1)[:B, :]


def init_params(key):
    """nn.Linear default init: U(-1/sqrt(fan_in), +1/sqrt(fan_in)).

    Weights are stored transposed relative to PyTorch, i.e. (in, out)."""
    k = jax.random.split(key, 6)

    def lin(kw, kb, fan_in, fan_out):
        bound = 1.0 / jnp.sqrt(jnp.float32(fan_in))
        w = jax.random.uniform(kw, (fan_in, fan_out), jnp.float32, -bound, bound)
        b = jax.random.uniform(kb, (fan_out,), jnp.float32, -bound, bound)
        return w, b

    w1, b1 = lin(k[0], k[1], D_IN, H1)
    w2, b2 = lin(k[2], k[3], H1, H2)
    w3, b3 = lin(k[4], k[5], H2, OUT)
    return (w1, b1, w2, b2, w3, b3)


def prepare_params(params):
    """Pad + cast parameters ONCE at init time (not per forward call).

    Zero padding is exact through Linear+ReLU; padded rows/cols contribute 0."""
    w1, b1, w2, b2, w3, b3 = params
    # TODO(synk): optional v7x-only fp8(e4m3) weight-only quant of w2, gated on
    # an accuracy check vs the f32 reference (skip on v5e: int8/int4 MXU only).
    w1_p = jnp.zeros((D_IN, H1_P), jnp.bfloat16).at[:, :H1].set(
        w1.astype(jnp.bfloat16))
    b1_p = jnp.zeros((1, H1_P), jnp.float32).at[0, :H1].set(b1.astype(jnp.float32))
    w2_p = jnp.zeros((H1_P, H2_P), jnp.bfloat16).at[:H1, :H2].set(
        w2.astype(jnp.bfloat16))
    b2_p = jnp.zeros((1, H2_P), jnp.float32).at[0, :H2].set(b2.astype(jnp.float32))
    # Layer-3 weight as a lane-dense (1, H2_P) row; tiny, kept f32.
    w3_p = jnp.zeros((1, H2_P), jnp.float32).at[0, :H2].set(w3[:, 0].astype(jnp.float32))
    b3_p = b3.reshape(1, 1).astype(jnp.float32)
    return (w1_p, b1_p, w2_p, b2_p, w3_p, b3_p)


def critic_ref(x, u, params, compute_dtype=jnp.float32):
    """Pure-JAX reference. With compute_dtype=bfloat16 it mirrors the kernel's
    bf16-operand / f32-accumulate math (layer 3 stays f32, as in the kernel)."""
    w1, b1, w2, b2, w3, b3 = params
    h = jnp.concatenate([x, u], axis=1)
    h = jnp.dot(h.astype(compute_dtype), w1.astype(compute_dtype),
                preferred_element_type=jnp.float32) + b1
    h = jax.nn.relu(h)
    h = jnp.dot(h.astype(compute_dtype), w2.astype(compute_dtype),
                preferred_element_type=jnp.float32) + b2
    h = jax.nn.relu(h)
    return jnp.dot(h, w3, preferred_element_type=jnp.float32) + b3


if __name__ == "__main__":
    key = jax.random.PRNGKey(0)
    kx, ku, kp = jax.random.split(key, 3)

    params = init_params(kp)
    padded = prepare_params(params)          # one-time padding / bf16 cast

    # Small batch (single grid step, TB=16).
    batch = 2
    x = jax.random.normal(kx, (batch, STATE_DIM), jnp.float32)
    u = jax.random.normal(ku, (batch, ACTION_DIM), jnp.float32)

    q = jax.block_until_ready(critic_forward(x, u, padded))
    assert q.shape == (batch, OUT), q.shape

    # Tight check against a reference that mirrors the kernel's bf16 math.
    q_ref_bf16 = critic_ref(x, u, params, compute_dtype=jnp.bfloat16)
    assert jnp.allclose(q, q_ref_bf16, atol=2e-3, rtol=2e-3), (q, q_ref_bf16)
    # Loose sanity check against the full-f32 module semantics.
    q_ref_f32 = critic_ref(x, u, params, compute_dtype=jnp.float32)
    assert jnp.allclose(q, q_ref_f32, atol=5e-2, rtol=5e-2), (q, q_ref_f32)

    # Larger batches exercise the adaptive tile + multi-step "parallel" grid:
    #   B=200  -> TB=112, Bp=224, 2 steps (low padded-row waste)
    #   B=1024 -> TB=512, Bp=1024, 2 steps (big tiles, fills MXU M dim)
    for batch2 in (200, 1024):
        kx2, ku2 = jax.random.split(jax.random.PRNGKey(batch2))
        x2 = jax.random.normal(kx2, (batch2, STATE_DIM), jnp.float32)
        u2 = jax.random.normal(ku2, (batch2, ACTION_DIM), jnp.float32)
        q2 = jax.block_until_ready(critic_forward(x2, u2, padded))
        q2_ref = critic_ref(x2, u2, params, compute_dtype=jnp.bfloat16)
        assert q2.shape == (batch2, OUT), q2.shape
        assert jnp.allclose(q2, q2_ref, atol=2e-3, rtol=2e-3), (q2, q2_ref)

    print("KERNEL_OK")
</pallas_src>

<mosaic_0001>
module attributes {stable_mosaic.version = 11 : i64} {
  func.func @critic_kernel(%arg0: i32, %arg1: memref<16x18xbf16, #tpu.memory_space<vmem>>, %arg2: memref<18x768xbf16, #tpu.memory_space<vmem>>, %arg3: memref<1x768xf32, #tpu.memory_space<vmem>>, %arg4: memref<768x512xbf16, #tpu.memory_space<vmem>>, %arg5: memref<1x512xf32, #tpu.memory_space<vmem>>, %arg6: memref<1x512xf32, #tpu.memory_space<vmem>>, %arg7: memref<1x1xf32, #tpu.memory_space<smem>>, %arg8: memref<1x1x16xf32, #tpu.memory_space<vmem>>) attributes {dimension_semantics = [#tpu.dimension_semantics<parallel>], iteration_bounds = array<i64: 1>, scalar_prefetch = 0 : i64, scratch_operands = 0 : i64, tpu.core_type = #tpu.core_type<tc>, window_params = [{transform_indices = @transform_0, window_bounds = array<i64: 16, 18>}, {pipeline_mode = #tpu.pipeline_mode<synchronous>, transform_indices = @transform_1, window_bounds = array<i64: 18, 768>}, {pipeline_mode = #tpu.pipeline_mode<synchronous>, transform_indices = @transform_2, window_bounds = array<i64: 1, 768>}, {pipeline_mode = #tpu.pipeline_mode<synchronous>, transform_indices = @transform_3, window_bounds = array<i64: 768, 512>}, {pipeline_mode = #tpu.pipeline_mode<synchronous>, transform_indices = @transform_4, window_bounds = array<i64: 1, 512>}, {pipeline_mode = #tpu.pipeline_mode<synchronous>, transform_indices = @transform_5, window_bounds = array<i64: 1, 512>}, {transform_indices = @transform_6, window_bounds = array<i64: 1, 1>}, {transform_indices = @transform_7, window_bounds = array<i64: 1, 1, 16>}]} {
    %c0 = arith.constant 0 : index
    %c0_0 = arith.constant 0 : index
    %0 = vector.load %arg1[%c0, %c0_0] : memref<16x18xbf16, #tpu.memory_space<vmem>>, vector<16x18xbf16>
    %c0_1 = arith.constant 0 : index
    %c0_2 = arith.constant 0 : index
    %1 = vector.load %arg2[%c0_1, %c0_2] : memref<18x768xbf16, #tpu.memory_space<vmem>>, vector<18x768xbf16>
    %cst = arith.constant dense<0.000000e+00> : vector<16x768xf32>
    %2 = tpu.matmul %0, %1, %cst {dimension_numbers = #tpu.dot_dimension_numbers<[1], [0], [0], [1], [0, 0, 1, 1], [], []>} : vector<16x18xbf16>, vector<18x768xbf16>, vector<16x768xf32> -> vector<16x768xf32>
    %c0_3 = arith.constant 0 : index
    %c0_4 = arith.constant 0 : index
    %3 = vector.load %arg3[%c0_3, %c0_4] : memref<1x768xf32, #tpu.memory_space<vmem>>, vector<1x768xf32>
    %4 = vector.broadcast %3 : vector<1x768xf32> to vector<16x768xf32>
    %5 = arith.addf %2, %4 : vector<16x768xf32>
    %cst_5 = arith.constant 0.000000e+00 : f32
    %6 = vector.broadcast %cst_5 : f32 to vector<16x768xf32>
    %7 = arith.maximumf %5, %6 : vector<16x768xf32>
    %8 = arith.truncf %7 : vector<16x768xf32> to vector<16x768xbf16>
    %c0_6 = arith.constant 0 : index
    %c0_7 = arith.constant 0 : index
    %9 = vector.load %arg4[%c0_6, %c0_7] : memref<768x512xbf16, #tpu.memory_space<vmem>>, vector<768x512xbf16>
    %cst_8 = arith.constant dense<0.000000e+00> : vector<16x512xf32>
    %10 = tpu.matmul %8, %9, %cst_8 {dimension_numbers = #tpu.dot_dimension_numbers<[1], [0], [0], [1], [0, 0, 1, 1], [], []>} : vector<16x768xbf16>, vector<768x512xbf16>, vector<16x512xf32> -> vector<16x512xf32>
    %c0_9 = arith.constant 0 : index
    %c0_10 = arith.constant 0 : index
    %11 = vector.load %arg5[%c0_9, %c0_10] : memref<1x512xf32, #tpu.memory_space<vmem>>, vector<1x512xf32>
    %12 = vector.broadcast %11 : vector<1x512xf32> to vector<16x512xf32>
    %13 = arith.addf %10, %12 : vector<16x512xf32>
    %cst_11 = arith.constant 0.000000e+00 : f32
    %14 = vector.broadcast %cst_11 : f32 to vector<16x512xf32>
    %15 = arith.maximumf %13, %14 : vector<16x512xf32>
    %c0_12 = arith.constant 0 : index
    %c0_13 = arith.constant 0 : index
    %16 = vector.load %arg6[%c0_12, %c0_13] : memref<1x512xf32, #tpu.memory_space<vmem>>, vector<1x512xf32>
    %17 = vector.broadcast %16 : vector<1x512xf32> to vector<16x512xf32>
    %18 = arith.mulf %15, %17 : vector<16x512xf32>
    %cst_14 = arith.constant dense<0.000000e+00> : vector<16xf32>
    %19 = vector.multi_reduction <add>, %18, %cst_14 [1] : vector<16x512xf32> to vector<16xf32>
    %20 = vector.shape_cast %19 : vector<16xf32> to vector<16x1xf32>
    %c0_15 = arith.constant 0 : index
    %c0_16 = arith.constant 0 : index
    %21 = memref.load %arg7[%c0_15, %c0_16] : memref<1x1xf32, #tpu.memory_space<smem>>
    %22 = vector.broadcast %21 : f32 to vector<16x1xf32>
    %23 = arith.addf %20, %22 : vector<16x1xf32>
    %24 = tpu.transpose %23, [1, 0] : vector<16x1xf32> -> vector<1x16xf32>
    %c0_17 = arith.constant 0 : index
    %c0_18 = arith.constant 0 : index
    %c0_19 = arith.constant 0 : index
    %25 = vector.load %arg8[%c0_17, %c0_18, %c0_19] : memref<1x1x16xf32, #tpu.memory_space<vmem>>, vector<1x1x16xf32>
    %26 = vector.shape_cast %25 : vector<1x1x16xf32> to vector<1x16xf32>
    %27 = vector.shape_cast %24 : vector<1x16xf32> to vector<1x1x16xf32>
    tpu.vector_store %arg8[%c0_17, %c0_18, %c0_19], %27 {strides = array<i32>} : memref<1x1x16xf32, #tpu.memory_space<vmem>>, vector<1x1x16xf32>,
    return
  }
  func.func @transform_0(%arg0: i32) -> (i32, i32) {
    %c0_i32 = arith.constant 0 : i32
    %c0_i32_0 = arith.constant 0 : i32
    return %arg0, %c0_i32 : i32, i32
  }
  func.func @transform_1(%arg0: i32) -> (i32, i32) {
    %c0_i32 = arith.constant 0 : i32
    %c0_i32_0 = arith.constant 0 : i32
    %c0_i32_1 = arith.constant 0 : i32
    return %c0_i32, %c0_i32_0 : i32, i32
  }
  func.func @transform_2(%arg0: i32) -> (i32, i32) {
    %c0_i32 = arith.constant 0 : i32
    %c0_i32_0 = arith.constant 0 : i32
    %c0_i32_1 = arith.constant 0 : i32
    return %c0_i32, %c0_i32_0 : i32, i32
  }
  func.func @transform_3(%arg0: i32) -> (i32, i32) {
    %c0_i32 = arith.constant 0 : i32
    %c0_i32_0 = arith.constant 0 : i32
    %c0_i32_1 = arith.constant 0 : i32
    return %c0_i32, %c0_i32_0 : i32, i32
  }
  func.func @transform_4(%arg0: i32) -> (i32, i32) {
    %c0_i32 = arith.constant 0 : i32
    %c0_i32_0 = arith.constant 0 : i32
    %c0_i32_1 = arith.constant 0 : i32
    return %c0_i32, %c0_i32_0 : i32, i32
  }
  func.func @transform_5(%arg0: i32) -> (i32, i32) {
    %c0_i32 = arith.constant 0 : i32
    %c0_i32_0 = arith.constant 0 : i32
    %c0_i32_1 = arith.constant 0 : i32
    return %c0_i32, %c0_i32_0 : i32, i32
  }
  func.func @transform_6(%arg0: i32) -> (i32, i32) {
    %c0_i32 = arith.constant 0 : i32
    %c0_i32_0 = arith.constant 0 : i32
    %c0_i32_1 = arith.constant 0 : i32
    return %c0_i32, %c0_i32_0 : i32, i32
  }
  func.func @transform_7(%arg0: i32) -> (i32, i32, i32) {
    %c0_i32 = arith.constant 0 : i32
    %c0_i32_0 = arith.constant 0 : i32
    %c0_i32_1 = arith.constant 0 : i32
    return %arg0, %c0_i32, %c0_i32_0 : i32, i32, i32
  }
}

</mosaic_0001>

<bundles_post_ra>
// kernel: critic_forward.1
= control target key start
LH: loop header
LB: loop body
LE: loop exit
PB: predicated region body
PF: predicated region fallthrough
CT: control target
= control target key end

     0   :  { %13 = vsyncpa [#allocation4], 0  ;;  %s3044_s0 = inlined_call_operand.vmem [shape: bf16[16,18], index: 0, kind: input, shape index: {}]   ;;  %s3045_s1 = inlined_call_operand.hbm [shape: bf16[18,768], index: 1, kind: input, shape index: {}]   ;;  %s3046_s2 = inlined_call_operand.vmem [shape: f32[1,768], index: 2, kind: input, shape index: {}]   ;;  %s3047_s3 = inlined_call_operand.hbm [shape: bf16[768,512], index: 3, kind: input, shape index: {}]   ;;  %s3048_s4 = inlined_call_operand.vmem [shape: f32[1,512], index: 4, kind: input, shape index: {}]   ;;  %s3049_s5 = inlined_call_operand.vmem [shape: f32[1,512], index: 5, kind: input, shape index: {}]   ;;  %s3050_s6 = inlined_call_operand.<no memory space> [shape: f32[1,1], index: 6, kind: input, shape index: {}]   ;;  %s3051_s7 = inlined_call_operand.vmem [shape: f32[1,1,16], index: 7, kind: output, shape index: {}]  }
   0x1   :  { %s21_s26 = sshll.u32 %s3045_s1, 4  ;;  %s22_s26 = int_to_ptr.hbm [resolvable:$true] %s21_s26 }
   0x2   :  { %14 = vsyncpa [#allocation6], 0  ;;  %s2898_s27 = smov [#allocation3]   ;;  %s36_s8 = sshll.u32 %s3047_s3, 4  ;;  %s37_s8 = int_to_ptr.hbm [resolvable:$true] %s36_s8 }
   0x3   :  { %s23_s28 = sshll.u32 %s2898_s27, 4  ;;  %s2899_s9 = smov 384   ;;  %s24_s28 = int_to_ptr.vmem [resolvable:$true] %s23_s28 }
   0x4   :  { %s2900_s10 = smov 24   ;;  %s2901_s11 = smov [#allocation5]  }
   0x5   :  { %29 = dma.hbm_to_vmem [thread:$0]  %s22_s26, 1152, %s24_s28, [#allocation4], %s2899_s9, %s2899_s9, %s2900_s10  }
   0x6   :  { %s38_s12 = sshll.u32 %s2901_s11, 4  ;;  %s2902_s13 = smov 256   ;;  %s39_s12 = int_to_ptr.vmem [resolvable:$true] %s38_s12 }
   0x7   :  { %s2903_s14 = smov 16  }
   0x8   :  { %44 = dma.hbm_to_vmem [thread:$0]  %s37_s8, 24576, %s39_s12, [#allocation6], %s2902_s13, %s2902_s13, %s2903_s14  }
   0x9   :  { %2894 = dma.done.wait [#allocation4], 1152  }
   0xa   :  { %2895 = vsyncadd [#allocation4], 4294966144 }
   0xb   :  { %2896 = dma.done.wait [#allocation6], 24576  }
   0xc   :  { %2897 = vsyncadd [#allocation6], 4294942720  ;;  %v68_v0 = vld [vmem:[#allocation3 + $0x30] sm:$0x11]  ;;  %v69_v1 = vld [vmem:[#allocation3 + $0x38] sm:$0x11] }
   0xd   :  { %v111_v2 = vunpack.c.l.b16 %v68_v0  ;;  %v112_v3 = vunpack.c.h.b16 %v68_v0  ;;  %v113_v4 = vunpack.c.l.b16 %v69_v1  ;;  %v114_v5 = vunpack.c.h.b16 %v69_v1  ;;  %v1844_v6 = vld [vmem:[#allocation3] sm:$0xf]  ;;  %v2644_v7 = vld [vmem:[#allocation3 + $0x14] sm:$0xf0]  ;;  %v2641_v8 = vld [vmem:[#allocation3 + $0x4] sm:$0xf] }
   0xe   :  { %vm139_vm0 = vcmask 1040384   ;;  %v1846_v13 = vld [vmem:[#allocation3 + $0x18] sm:$0xf0]  ;;  %v1852_v14 = vld [vmem:[#allocation3 + $0x8] sm:$0xf]  ;;  %v1845_v16 = vor.u32 %v2644_v7, %v1844_v6  ;;  %vm135_vm1 = vcmask 146432  }
   0xf   :  { %v123_v9 = vpack.c.b16 %v111_v2, %v111_v2  ;;  %v124_v10 = vpack.c.b16 %v112_v3, %v112_v3  ;;  %v125_v11 = vpack.c.b16 %v113_v4, %v113_v4  ;;  %v126_v12 = vpack.c.b16 %v114_v5, %v114_v5  ;;  %v70_v15 = vld [vmem:[#allocation3 + $0x40] sm:$0x11]  ;;  %v2642_v18 = vld [vmem:[#allocation3 + $0xc] sm:$0xf]  ;;  %v1860_v32 = vld [vmem:[#allocation3 + $0x10] sm:$0xf] }
  0x10   :  { %v2645_v17 = vld [vmem:[#allocation3 + $0x1c] sm:$0xf0]  ;;  %v1854_v19 = vld [vmem:[#allocation3 + $0x20] sm:$0xf0]  ;;  %v115_v20 = vunpack.c.l.b16 %v70_v15  ;;  %v116_v21 = vunpack.c.h.b16 %v70_v15  ;;  %v1849_v26 = vor.u32 %v2641_v8, %v1846_v13  ;;  %v2646_v33 = vld [vmem:[#allocation3 + $0x24] sm:$0xf0] }
  0x11   :  { %v141_v22 = vsel %vm139_vm0, %v123_v9, 0  ;;  %v144_v23 = vsel %vm139_vm0, %v124_v10, 0  ;;  %v147_v24 = vsel %vm139_vm0, %v125_v11, 0  ;;  %v150_v25 = vsel %vm139_vm0, %v126_v12, 0  ;;  %v2957_v31 = vld [vmem:[%s3044_s0] sm:$0xff] }
  0x12   :  { %164 = vmatpush.bf16.msra.mxu0 %v141_v22  ;;  %178 = vmatpush.bf16.msra.mxu1 %v144_v23  ;;  %v127_v27 = vpack.c.b16 %v115_v20, %v115_v20  ;;  %v128_v28 = vpack.c.b16 %v116_v21, %v116_v21  ;;  %v1853_v29 = vor.u32 %v2645_v17, %v1852_v14  ;;  %v2643_v34 = vld [vmem:[#allocation3 + $0x14] sm:$0xf]  ;;  %v1986_v35 = vld [vmem:[#allocation5 + $0xe0] sm:$0xf]  ;;  %v2677_v36 = vld [vmem:[#allocation5 + $0xec] sm:$0xf0] }
  0x13   :  { %192 = vmatpush.bf16.msra.mxu2 %v147_v24  ;;  %206 = vmatpush.bf16.msra.mxu3 %v150_v25  ;;  %v1857_v30 = vor.u32 %v2642_v18, %v1854_v19  ;;  %v2114_v37 = vld [vmem:[#allocation5 + $0x1e0] sm:$0xf]  ;;  %v2709_v38 = vld [vmem:[#allocation5 + $0x1ec] sm:$0xf0]  ;;  %v1862_v41 = vld [vmem:[#allocation3 + $0x28] sm:$0xf0]  ;;  %v1987_v46 = vor.u32 %v2677_v36, %v1986_v35  ;;  %v1861_v49 = vor.u32 %v2646_v33, %v1860_v32 }
  0x14   :  { %v153_v39 = vsel %vm139_vm0, %v127_v27, 0  ;;  %v156_v40 = vsel %vm139_vm0, %v128_v28, 0  ;;  %v2242_v42 = vld [vmem:[#allocation5 + $0x2e0] sm:$0xf]  ;;  %v2741_v43 = vld [vmem:[#allocation5 + $0x2ec] sm:$0xf0]  ;;  %v2115_v47 = vor.u32 %v2709_v38, %v2114_v37  ;;  %v1865_v50 = vor.u32 %v2643_v34, %v1862_v41 }
  0x15   :  { %v2370_v44 = vld [vmem:[#allocation5 + $0x3e0] sm:$0xf]  ;;  %v2773_v45 = vld [vmem:[#allocation5 + $0x3ec] sm:$0xf0]  ;;  %v2243_v54 = vor.u32 %v2741_v43, %v2242_v42  ;;  %vm1830_vm2 = vcmask 122880  }
  0x16   :  { %165 = vmatpush.bf16.msra.mxu0 %v1845_v16  ;;  %179 = vmatpush.bf16.msra.mxu1 %v1849_v26  ;;  %v1970_v48 = vld [vmem:[#allocation5 + $0xc0] sm:$0xf]  ;;  %v2673_v51 = vld [vmem:[#allocation5 + $0xcc] sm:$0xf0]  ;;  %v2371_v55 = vor.u32 %v2773_v45, %v2370_v44 }
  0x17   :  { %193 = vmatpush.bf16.msra.mxu2 %v1853_v29  ;;  %207 = vmatpush.bf16.msra.mxu3 %v1857_v30  ;;  %v2098_v52 = vld [vmem:[#allocation5 + $0x1c0] sm:$0xf]  ;;  %v2705_v53 = vld [vmem:[#allocation5 + $0x1cc] sm:$0xf0]  ;;  %v1971_v60 = vor.u32 %v2673_v51, %v1970_v48 }
  0x18   :  { %v2226_v56 = vld [vmem:[#allocation5 + $0x2c0] sm:$0xf]  ;;  %v2737_v57 = vld [vmem:[#allocation5 + $0x2cc] sm:$0xf0]  ;;  %v2099_v61 = vor.u32 %v2705_v53, %v2098_v52 }
  0x19   :  { %1866 = vmatmul.msk.bf16.vlgmr.msra.gmra.mxu0 %vm135_vm1, %v2957_v31  ;;  %1867 = vmatmul.msk.bf16.vlgmr.msra.gmra.mxu1 %vm135_vm1, %v2957_v31  ;;  %v2354_v58 = vld [vmem:[#allocation5 + $0x3c0] sm:$0xf]  ;;  %v2769_v59 = vld [vmem:[#allocation5 + $0x3cc] sm:$0xf0]  ;;  %v2227_v2 = vor.u32 %v2737_v57, %v2226_v56 }
  0x1a   :  { %220 = vmatpush.bf16.msrb.mxu0 %v153_v39  ;;  %234 = vmatpush.bf16.msrb.mxu1 %v156_v40  ;;  %v1954_v62 = vld [vmem:[#allocation5 + $0xa0] sm:$0xf]  ;;  %v2669_v63 = vld [vmem:[#allocation5 + $0xac] sm:$0xf0]  ;;  %v2355_v3 = vor.u32 %v2769_v59, %v2354_v58 }
  0x1b   :  { %1868 = vmatmul.msk.bf16.vlgmr.msra.gmra.mxu2 %vm135_vm1, %v2957_v31  ;;  %1869 = vmatmul.msk.bf16.vlgmr.msra.gmra.mxu3 %vm135_vm1, %v2957_v31  ;;  %v2082_v0 = vld [vmem:[#allocation5 + $0x1a0] sm:$0xf]  ;;  %v2701_v1 = vld [vmem:[#allocation5 + $0x1ac] sm:$0xf0]  ;;  %v1955_v8 = vor.u32 %v2669_v63, %v1954_v62 }
  0x1c   :  { %1422 = vmatpush.bf16.msrb.mxu2 %v1987_v46  ;;  %1436 = vmatpush.bf16.msrb.mxu3 %v2115_v47  ;;  %v2210_v4 = vld [vmem:[#allocation5 + $0x2a0] sm:$0xf]  ;;  %v2733_v5 = vld [vmem:[#allocation5 + $0x2ac] sm:$0xf0]  ;;  %v2083_v9 = vor.u32 %v2701_v1, %v2082_v0 }
  0x1d   :  { %v2338_v6 = vld [vmem:[#allocation5 + $0x3a0] sm:$0xf]  ;;  %v2765_v7 = vld [vmem:[#allocation5 + $0x3ac] sm:$0xf0]  ;;  %v2211_v14 = vor.u32 %v2733_v5, %v2210_v4 }
  0x1e   :  { %221 = vmatpush.bf16.msrb.mxu0 %v1861_v49  ;;  %235 = vmatpush.bf16.msrb.mxu1 %v1865_v50  ;;  %v1938_v10 = vld [vmem:[#allocation5 + $0x80] sm:$0xf]  ;;  %v2665_v11 = vld [vmem:[#allocation5 + $0x8c] sm:$0xf0]  ;;  %v2339_v15 = vor.u32 %v2765_v7, %v2338_v6 }
  0x1f   :  { %v2066_v12 = vld [vmem:[#allocation5 + $0x180] sm:$0xf]  ;;  %v2697_v13 = vld [vmem:[#allocation5 + $0x18c] sm:$0xf0]  ;;  %v1939_v18 = vor.u32 %v2665_v11, %v1938_v10  ;;  %v2675_v11 = vld [vmem:[#allocation5 + $0xe4] sm:$0xf] }
  0x20   :  { %1423 = vmatpush.bf16.msrb.mxu2 %v1971_v60  ;;  %1437 = vmatpush.bf16.msrb.mxu3 %v2099_v61  ;;  %v1922_v16 = vld [vmem:[#allocation5 + $0x60] sm:$0xf]  ;;  %v2067_v19 = vor.u32 %v2697_v13, %v2066_v12  ;;  %v2729_v20 = vld [vmem:[#allocation5 + $0x28c] sm:$0xf0] }
  0x21   :  { %v2194_v17 = vld [vmem:[#allocation5 + $0x280] sm:$0xf]  ;;  %v2761_v22 = vld [vmem:[#allocation5 + $0x38c] sm:$0xf0] }
  0x22   :  { %1450 = vmatpush.bf16.msra.mxu0 %v2243_v54  ;;  %1464 = vmatpush.bf16.msra.mxu1 %v2371_v55  ;;  %v2322_v21 = vld [vmem:[#allocation5 + $0x380] sm:$0xf]  ;;  %v2661_v23 = vld [vmem:[#allocation5 + $0x6c] sm:$0xf0]  ;;  %v2195_v26 = vor.u32 %v2729_v20, %v2194_v17 }
  0x23   :  { %v2050_v24 = vld [vmem:[#allocation5 + $0x160] sm:$0xf]  ;;  %v2693_v25 = vld [vmem:[#allocation5 + $0x16c] sm:$0xf0]  ;;  %v2323_v27 = vor.u32 %v2761_v22, %v2322_v21  ;;  %v1923_v30 = vor.u32 %v2661_v23, %v1922_v16  ;;  %v2116_v16 = vld [vmem:[#allocation5 + $0x1f0] sm:$0xf0] }
  0x24   :  { %1424 = vmatpush.bf16.msrb.mxu2 %v1955_v8  ;;  %1438 = vmatpush.bf16.msrb.mxu3 %v2083_v9  ;;  %v1906_v28 = vld [vmem:[#allocation5 + $0x40] sm:$0xf]  ;;  %v2051_v32 = vor.u32 %v2693_v25, %v2050_v24  ;;  %v2725_v33 = vld [vmem:[#allocation5 + $0x26c] sm:$0xf0]  ;;  %v2671_v25 = vld [vmem:[#allocation5 + $0xc4] sm:$0xf] }
  0x25   :  { %v2178_v29 = vld [vmem:[#allocation5 + $0x260] sm:$0xf]  ;;  %v2757_v35 = vld [vmem:[#allocation5 + $0x36c] sm:$0xf0] }
  0x26   :  { %1451 = vmatpush.bf16.msra.mxu0 %v2227_v2  ;;  %1465 = vmatpush.bf16.msra.mxu1 %v2355_v3  ;;  %v2306_v34 = vld [vmem:[#allocation5 + $0x360] sm:$0xf]  ;;  %v2657_v36 = vld [vmem:[#allocation5 + $0x4c] sm:$0xf0]  ;;  %v2179_v39 = vor.u32 %v2725_v33, %v2178_v29  ;;  %v2703_v29 = vld [vmem:[#allocation5 + $0x1c4] sm:$0xf] }
  0x27   :  { %v2034_v37 = vld [vmem:[#allocation5 + $0x140] sm:$0xf]  ;;  %v2689_v38 = vld [vmem:[#allocation5 + $0x14c] sm:$0xf0]  ;;  %v2307_v40 = vor.u32 %v2757_v35, %v2306_v34  ;;  %v1907_v43 = vor.u32 %v2657_v36, %v1906_v28  ;;  %v1972_v28 = vld [vmem:[#allocation5 + $0xd0] sm:$0xf0] }
  0x28   :  { %1425 = vmatpush.bf16.msrb.mxu2 %v1939_v18  ;;  %1439 = vmatpush.bf16.msrb.mxu3 %v2067_v19  ;;  %v1890_v41 = vld [vmem:[#allocation5 + $0x20] sm:$0xf]  ;;  %v2035_v44 = vor.u32 %v2689_v38, %v2034_v37  ;;  %v2721_v45 = vld [vmem:[#allocation5 + $0x24c] sm:$0xf0]  ;;  %v1975_v35 = vor.u32 %v2671_v25, %v1972_v28  ;;  %v2651_v28 = vld [vmem:[#allocation5 + $0x24] sm:$0xf] }
  0x29   :  { %1870 = vmatmul.msk.bf16.vlgmr.msrb.gmra.mxu0 %vm135_vm1, %v2957_v31  ;;  %1871 = vmatmul.msk.bf16.vlgmr.msrb.gmra.mxu1 %vm135_vm1, %v2957_v31  ;;  %v2162_v42 = vld [vmem:[#allocation5 + $0x240] sm:$0xf]  ;;  %v2753_v47 = vld [vmem:[#allocation5 + $0x34c] sm:$0xf0] }
  0x2a   :  { %1452 = vmatpush.bf16.msra.mxu0 %v2211_v14  ;;  %1466 = vmatpush.bf16.msra.mxu1 %v2339_v15  ;;  %v2290_v46 = vld [vmem:[#allocation5 + $0x340] sm:$0xf]  ;;  %v2653_v48 = vld [vmem:[#allocation5 + $0x2c] sm:$0xf0]  ;;  %v2163_v51 = vor.u32 %v2721_v45, %v2162_v42  ;;  %v1988_v14 = vld [vmem:[#allocation5 + $0xf0] sm:$0xf0] }
  0x2b   :  { %v2018_v49 = vld [vmem:[#allocation5 + $0x120] sm:$0xf]  ;;  %v2685_v50 = vld [vmem:[#allocation5 + $0x12c] sm:$0xf0]  ;;  %v2291_v31 = vor.u32 %v2753_v47, %v2290_v46  ;;  %v1891_v55 = vor.u32 %v2653_v48, %v1890_v41  ;;  %v2707_v15 = vld [vmem:[#allocation5 + $0x1e4] sm:$0xf]  ;;  %v1991_v22 = vor.u32 %v2675_v11, %v1988_v14 }
  0x2c   :  { %1426 = vmatpush.bf16.msrb.mxu2 %v1923_v30  ;;  %1440 = vmatpush.bf16.msrb.mxu3 %v2051_v32  ;;  %v1874_v52 = vld [vmem:[#allocation5] sm:$0xf]  ;;  %v2649_v53 = vld [vmem:[#allocation5 + $0xc] sm:$0xf0]  ;;  %v2019_v56 = vor.u32 %v2685_v50, %v2018_v49  ;;  %v2119_v23 = vor.u32 %v2707_v15, %v2116_v16  ;;  %v2100_v30 = vld [vmem:[#allocation5 + $0x1d0] sm:$0xf0] }
  0x2d   :  { %v2146_v54 = vld [vmem:[#allocation5 + $0x220] sm:$0xf]  ;;  %v2717_v57 = vld [vmem:[#allocation5 + $0x22c] sm:$0xf0]  ;;  %v1875_v6 = vor.u32 %v2649_v53, %v1874_v52  ;;  %v2103_v36 = vor.u32 %v2703_v29, %v2100_v30  ;;  %v2667_v45 = vld [vmem:[#allocation5 + $0xa4] sm:$0xf] }
  0x2e   :  { %1453 = vmatpush.bf16.msra.mxu0 %v2195_v26  ;;  %1467 = vmatpush.bf16.msra.mxu1 %v2323_v27  ;;  %v2274_v58 = vld [vmem:[#allocation5 + $0x320] sm:$0xf]  ;;  %v2749_v59 = vld [vmem:[#allocation5 + $0x32c] sm:$0xf0]  ;;  %v2147_v2 = vor.u32 %v2717_v57, %v2146_v54  ;;  %v1956_v46 = vld [vmem:[#allocation5 + $0xb0] sm:$0xf0] }
  0x2f   :  { %v2002_v60 = vld [vmem:[#allocation5 + $0x100] sm:$0xf]  ;;  %v2681_v61 = vld [vmem:[#allocation5 + $0x10c] sm:$0xf0]  ;;  %v2275_v3 = vor.u32 %v2749_v59, %v2274_v58  ;;  %v2699_v47 = vld [vmem:[#allocation5 + $0x1a4] sm:$0xf]  ;;  %v1959_v48 = vor.u32 %v2667_v45, %v1956_v46 }
  0x30   :  { %1427 = vmatpush.bf16.msrb.mxu2 %v1907_v43  ;;  %1441 = vmatpush.bf16.msrb.mxu3 %v2035_v44  ;;  %v2498_v62 = vld [vmem:[#allocation5 + $0x4e0] sm:$0xf]  ;;  %v2805_v63 = vld [vmem:[#allocation5 + $0x4ec] sm:$0xf0]  ;;  %v2003_v7 = vor.u32 %v2681_v61, %v2002_v60  ;;  %v2084_v49 = vld [vmem:[#allocation5 + $0x1b0] sm:$0xf0] }
  0x31   :  { %v2626_v0 = vld [vmem:[#allocation5 + $0x5e0] sm:$0xf]  ;;  %v2837_v1 = vld [vmem:[#allocation5 + $0x5ec] sm:$0xf0]  ;;  %v2499_v12 = vor.u32 %v2805_v63, %v2498_v62  ;;  %v2087_v50 = vor.u32 %v2699_v47, %v2084_v49  ;;  %v1940_v57 = vld [vmem:[#allocation5 + $0x90] sm:$0xf0] }
  0x32   :  { %1454 = vmatpush.bf16.msra.mxu0 %v2179_v39  ;;  %1468 = vmatpush.bf16.msra.mxu1 %v2307_v40  ;;  %v2130_v4 = vld [vmem:[#allocation5 + $0x200] sm:$0xf]  ;;  %v2713_v5 = vld [vmem:[#allocation5 + $0x20c] sm:$0xf0]  ;;  %v2627_v13 = vor.u32 %v2837_v1, %v2626_v0  ;;  %v2695_v59 = vld [vmem:[#allocation5 + $0x184] sm:$0xf] }
  0x33   :  { %v2482_v8 = vld [vmem:[#allocation5 + $0x4c0] sm:$0xf]  ;;  %v2745_v10 = vld [vmem:[#allocation5 + $0x30c] sm:$0xf0]  ;;  %v2131_v20 = vor.u32 %v2713_v5, %v2130_v4  ;;  %v2068_v60 = vld [vmem:[#allocation5 + $0x190] sm:$0xf0] }
  0x34   :  { %1428 = vmatpush.bf16.msrb.mxu2 %v1891_v55  ;;  %1442 = vmatpush.bf16.msrb.mxu3 %v2019_v56  ;;  %v2258_v9 = vld [vmem:[#allocation5 + $0x300] sm:$0xf]  ;;  %v2801_v17 = vld [vmem:[#allocation5 + $0x4cc] sm:$0xf0]  ;;  %v2663_v56 = vld [vmem:[#allocation5 + $0x84] sm:$0xf]  ;;  %v2071_v61 = vor.u32 %v2695_v59, %v2068_v60 }
  0x35   :  { %v2610_v18 = vld [vmem:[#allocation5 + $0x5c0] sm:$0xf]  ;;  %v2833_v19 = vld [vmem:[#allocation5 + $0x5cc] sm:$0xf0]  ;;  %v2259_v21 = vor.u32 %v2745_v10, %v2258_v9  ;;  %v2483_v26 = vor.u32 %v2801_v17, %v2482_v8  ;;  %v1943_v58 = vor.u32 %v2663_v56, %v1940_v57  ;;  %v2659_v4 = vld [vmem:[#allocation5 + $0x64] sm:$0xf] }
  0x36   :  { %1455 = vmatpush.bf16.msra.mxu0 %v2163_v51  ;;  %1469 = vmatpush.bf16.msra.mxu1 %v2291_v31  ;;  %v2466_v24 = vld [vmem:[#allocation5 + $0x4a0] sm:$0xf]  ;;  %v2611_v27 = vor.u32 %v2833_v19, %v2610_v18  ;;  %v2797_v32 = vld [vmem:[#allocation5 + $0x4ac] sm:$0xf0]  ;;  %v1924_v5 = vld [vmem:[#allocation5 + $0x70] sm:$0xf0] }
  0x37   :  { %v2594_v33 = vld [vmem:[#allocation5 + $0x5a0] sm:$0xf]  ;;  %v2829_v34 = vld [vmem:[#allocation5 + $0x5ac] sm:$0xf0]  ;;  %v2467_v37 = vor.u32 %v2797_v32, %v2466_v24  ;;  %v2052_v8 = vld [vmem:[#allocation5 + $0x170] sm:$0xf0] }
  0x38   :  { %1429 = vmatpush.bf16.msrb.mxu2 %v1875_v6  ;;  %1443 = vmatpush.bf16.msrb.mxu3 %v2003_v7  ;;  %v2595_v38 = vor.u32 %v2829_v34, %v2594_v33  ;;  %v2450_v39 = vld [vmem:[#allocation5 + $0x480] sm:$0xf]  ;;  %v2793_v40 = vld [vmem:[#allocation5 + $0x48c] sm:$0xf0]  ;;  %v2691_v6 = vld [vmem:[#allocation5 + $0x164] sm:$0xf]  ;;  %v1927_v7 = vor.u32 %v2659_v4, %v1924_v5 }
  0x39   :  { %v2578_v41 = vld [vmem:[#allocation5 + $0x580] sm:$0xf]  ;;  %v2825_v42 = vld [vmem:[#allocation5 + $0x58c] sm:$0xf0]  ;;  %v2451_v43 = vor.u32 %v2793_v40, %v2450_v39  ;;  %v2055_v9 = vor.u32 %v2691_v6, %v2052_v8  ;;  %v2655_v16 = vld [vmem:[#allocation5 + $0x44] sm:$0xf] }
  0x3a   :  { %1456 = vmatpush.bf16.msra.mxu0 %v2147_v2  ;;  %1470 = vmatpush.bf16.msra.mxu1 %v2275_v3  ;;  %v2579_v44 = vor.u32 %v2825_v42, %v2578_v41  ;;  %v2434_v51 = vld [vmem:[#allocation5 + $0x460] sm:$0xf]  ;;  %v2789_v31 = vld [vmem:[#allocation5 + $0x46c] sm:$0xf0]  ;;  %v1908_v17 = vld [vmem:[#allocation5 + $0x50] sm:$0xf0] }
  0x3b   :  { %v2562_v52 = vld [vmem:[#allocation5 + $0x560] sm:$0xf]  ;;  %v2435_v53 = vor.u32 %v2789_v31, %v2434_v51  ;;  %v2821_v54 = vld [vmem:[#allocation5 + $0x56c] sm:$0xf0]  ;;  %v1911_v18 = vor.u32 %v2655_v16, %v1908_v17  ;;  %v2687_v19 = vld [vmem:[#allocation5 + $0x144] sm:$0xf] }
  0x3c   :  { %1478 = vmatpush.bf16.msra.mxu2 %v2499_v12  ;;  %1492 = vmatpush.bf16.msra.mxu3 %v2627_v13  ;;  %v2563_v55 = vor.u32 %v2821_v54, %v2562_v52  ;;  %v2418_v62 = vld [vmem:[#allocation5 + $0x440] sm:$0xf]  ;;  %v2785_v63 = vld [vmem:[#allocation5 + $0x44c] sm:$0xf0]  ;;  %v1892_v29 = vld [vmem:[#allocation5 + $0x30] sm:$0xf0] }
  0x3d   :  { %v2546_v0 = vld [vmem:[#allocation5 + $0x540] sm:$0xf]  ;;  %v2419_v1 = vor.u32 %v2785_v63, %v2418_v62  ;;  %v2817_v2 = vld [vmem:[#allocation5 + $0x54c] sm:$0xf0]  ;;  %v2683_v30 = vld [vmem:[#allocation5 + $0x124] sm:$0xf]  ;;  %v1895_v33 = vor.u32 %v2651_v28, %v1892_v29 }
  0x3e   :  { %1457 = vmatpush.bf16.msra.mxu0 %v2131_v20  ;;  %1471 = vmatpush.bf16.msra.mxu1 %v2259_v21  ;;  %v2547_v3 = vor.u32 %v2817_v2, %v2546_v0  ;;  %v2402_v10 = vld [vmem:[#allocation5 + $0x420] sm:$0xf]  ;;  %v2781_v11 = vld [vmem:[#allocation5 + $0x42c] sm:$0xf0]  ;;  %v2036_v20 = vld [vmem:[#allocation5 + $0x150] sm:$0xf0] }
  0x3f   :  { %v2530_v12 = vld [vmem:[#allocation5 + $0x520] sm:$0xf]  ;;  %v2403_v13 = vor.u32 %v2781_v11, %v2402_v10  ;;  %v2813_v14 = vld [vmem:[#allocation5 + $0x52c] sm:$0xf0]  ;;  %v2039_v21 = vor.u32 %v2687_v19, %v2036_v20  ;;  %v2020_v32 = vld [vmem:[#allocation5 + $0x130] sm:$0xf0] }
  0x40   :  { %1479 = vmatpush.bf16.msra.mxu2 %v2483_v26  ;;  %1493 = vmatpush.bf16.msra.mxu3 %v2611_v27  ;;  %v2531_v15 = vor.u32 %v2813_v14, %v2530_v12  ;;  %v2514_v24 = vld [vmem:[#allocation5 + $0x500] sm:$0xf]  ;;  %v2809_v26 = vld [vmem:[#allocation5 + $0x50c] sm:$0xf0]  ;;  %v2023_v34 = vor.u32 %v2683_v30, %v2020_v32  ;;  %v2004_v39 = vld [vmem:[#allocation5 + $0x110] sm:$0xf0] }
  0x41   :  { %v2515_v27 = vor.u32 %v2809_v26, %v2514_v24  ;;  %v2976_v41 = vld [vmem:[%s3046_s2] sm:$0x3f]  ;;  %v2739_v31 = vld [vmem:[#allocation5 + $0x2e4] sm:$0xf]  ;;  %v2244_v54 = vld [vmem:[#allocation5 + $0x2f0] sm:$0xf0] }
  0x42   :  { %1506 = vmatpush.bf16.msrb.mxu0 %v1991_v22  ;;  %1520 = vmatpush.bf16.msrb.mxu1 %v2119_v23  ;;  %v2386_v22 = vld [vmem:[#allocation5 + $0x400] sm:$0xf]  ;;  %v2777_v23 = vld [vmem:[#allocation5 + $0x40c] sm:$0xf0]  ;;  %v74_v45 = vperm.slane %v2976_v41, 1  ;;  %v75_v57 = vperm.slane %v2976_v41, 2  ;;  %v2247_v63 = vor.u32 %v2739_v31, %v2244_v54 }
  0x43   :  { %v2387_v25 = vor.u32 %v2777_v23, %v2386_v22  ;;  %v2372_v56 = vld [vmem:[#allocation5 + $0x3f0] sm:$0xf0]  ;;  %v2767_v5 = vld [vmem:[#allocation5 + $0x3c4] sm:$0xf]  ;;  %v77_v23 = vperm.slane %v2976_v41, 4  ;;  %v78_v24 = vperm.slane %v2976_v41, 5 }
  0x44   :  { %1480 = vmatpush.bf16.msra.mxu2 %v2467_v37  ;;  %1494 = vmatpush.bf16.msra.mxu3 %v2595_v38  ;;  %v2679_v38 = vld [vmem:[#allocation5 + $0x104] sm:$0xf]  ;;  %v2228_v2 = vld [vmem:[#allocation5 + $0x2d0] sm:$0xf0] }
  0x45   :  { %v2007_v40 = vor.u32 %v2679_v38, %v2004_v39  ;;  %v2356_v6 = vld [vmem:[#allocation5 + $0x3d0] sm:$0xf0]  ;;  %v2803_v12 = vld [vmem:[#allocation5 + $0x4e4] sm:$0xf] }
  0x46   :  { %1507 = vmatpush.bf16.msrb.mxu0 %v1975_v35  ;;  %1521 = vmatpush.bf16.msrb.mxu1 %v2103_v36  ;;  %v2647_v35 = vld [vmem:[#allocation5 + $0x4] sm:$0xf]  ;;  %v1876_v36 = vld [vmem:[#allocation5 + $0x10] sm:$0xf0]  ;;  %v2359_v19 = vor.u32 %v2767_v5, %v2356_v6 }
  0x47   :  { %v1879_v37 = vor.u32 %v2647_v35, %v1876_v36  ;;  %v2835_v14 = vld [vmem:[#allocation5 + $0x5e4] sm:$0xf]  ;;  %v2628_v20 = vld [vmem:[#allocation5 + $0x5f0] sm:$0xf0] }
  0x48   :  { %1481 = vmatpush.bf16.msra.mxu2 %v2451_v43  ;;  %1495 = vmatpush.bf16.msra.mxu3 %v2579_v44  ;;  %v73_v44 = vperm.slane %v2976_v41, 0  ;;  %v2212_v22 = vld [vmem:[#allocation5 + $0x2b0] sm:$0xf0]  ;;  %v2799_v35 = vld [vmem:[#allocation5 + $0x4c4] sm:$0xf] }
  0x49   :  { %v2340_v26 = vld [vmem:[#allocation5 + $0x3b0] sm:$0xf0] }
  0x4a   :  { %1508 = vmatpush.bf16.msrb.mxu0 %v1959_v48  ;;  %1522 = vmatpush.bf16.msrb.mxu1 %v2087_v50  ;;  %v2484_v36 = vld [vmem:[#allocation5 + $0x4d0] sm:$0xf0] }
  0x4b   :  { %v2468_v54 = vld [vmem:[#allocation5 + $0x4b0] sm:$0xf0] }
  0x4c   :  { %1482 = vmatpush.bf16.msra.mxu2 %v2435_v53  ;;  %1496 = vmatpush.bf16.msra.mxu3 %v2563_v55  ;;  %v2771_v55 = vld [vmem:[#allocation5 + $0x3e4] sm:$0xf] }
  0x4d   :  { %v2375_v0 = vor.u32 %v2771_v55, %v2372_v56  ;;  %v2827_v55 = vld [vmem:[#allocation5 + $0x5a4] sm:$0xf]  ;;  %v2596_v56 = vld [vmem:[#allocation5 + $0x5b0] sm:$0xf0] }
  0x4e   :  { %1509 = vmatpush.bf16.msrb.mxu0 %v1943_v58  ;;  %1523 = vmatpush.bf16.msrb.mxu1 %v2071_v61  ;;  %v76_v58 = vperm.slane %v2976_v41, 3  ;;  %v2612_v41 = vld [vmem:[#allocation5 + $0x5d0] sm:$0xf0]  ;;  %v2599_v6 = vor.u32 %v2827_v55, %v2596_v56 }
  0x50   :  { %1483 = vmatpush.bf16.msra.mxu2 %v2419_v1  ;;  %1497 = vmatpush.bf16.msra.mxu3 %v2547_v3  ;;  %v2735_v1 = vld [vmem:[#allocation5 + $0x2c4] sm:$0xf] }
  0x51   :  { %v2231_v11 = vor.u32 %v2735_v1, %v2228_v2 }
  0x52   :  { %1510 = vmatpush.bf16.msrb.mxu0 %v1927_v7  ;;  %1524 = vmatpush.bf16.msrb.mxu1 %v2055_v9 }
  0x54   :  { %1484 = vmatpush.bf16.msra.mxu2 %v2403_v13  ;;  %1498 = vmatpush.bf16.msra.mxu3 %v2531_v15  ;;  %v2500_v13 = vld [vmem:[#allocation5 + $0x4f0] sm:$0xf0] }
  0x55   :  { %v2503_v32 = vor.u32 %v2803_v12, %v2500_v13 }
  0x56   :  { %1511 = vmatpush.bf16.msrb.mxu0 %v1911_v18  ;;  %1525 = vmatpush.bf16.msrb.mxu1 %v2039_v21  ;;  %v2731_v21 = vld [vmem:[#allocation5 + $0x2a4] sm:$0xf] }
  0x58   :  { %1485 = vmatpush.bf16.msra.mxu2 %v2387_v25  ;;  %1499 = vmatpush.bf16.msra.mxu3 %v2515_v27  ;;  %v2763_v25 = vld [vmem:[#allocation5 + $0x3a4] sm:$0xf] }
  0x59   :  { %v2343_v39 = vor.u32 %v2763_v25, %v2340_v26 }
  0x5a   :  { %1512 = vmatpush.bf16.msrb.mxu0 %v1895_v33  ;;  %1526 = vmatpush.bf16.msrb.mxu1 %v2023_v34  ;;  %v2631_v33 = vor.u32 %v2835_v14, %v2628_v20  ;;  %v2215_v34 = vor.u32 %v2731_v21, %v2212_v22  ;;  %v2787_v21 = vld [vmem:[#allocation5 + $0x464] sm:$0xf]  ;;  %v2436_v22 = vld [vmem:[#allocation5 + $0x470] sm:$0xf0] }
  0x5e   :  { %1513 = vmatpush.bf16.msrb.mxu0 %v1879_v37  ;;  %1527 = vmatpush.bf16.msrb.mxu1 %v2007_v40  ;;  %v2831_v40 = vld [vmem:[#allocation5 + $0x5c4] sm:$0xf] }
  0x96   :  { %v167_v42 = vpop.f32.mrf.mxu0  ;;  %v181_v43 = vpop.f32.mrf.mxu1 }
  0x97   :  { %v168_v46 = vadd.f32 %v167_v42, %v73_v44  ;;  %v182_v47 = vadd.f32 %v181_v43, %v74_v45  ;;  %v2727_v42 = vld [vmem:[#allocation5 + $0x284] sm:$0xf] }
  0x99   :  { %v242_v59 = vmax.f32 %v168_v46, 0.0  ;;  %v243_v60 = vmax.f32 %v182_v47, 0.0  ;;  %v2759_v46 = vld [vmem:[#allocation5 + $0x384] sm:$0xf]  ;;  %v2324_v47 = vld [vmem:[#allocation5 + $0x390] sm:$0xf0] }
  0x9e   :  { %v195_v48 = vpop.f32.mrf.mxu2  ;;  %v209_v49 = vpop.f32.mrf.mxu3 }
  0x9f   :  { %v169_v50 = vpop.f32.mrf.mxu0  ;;  %v183_v51 = vpop.f32.mrf.mxu1  ;;  %v196_v7 = vadd.f32 %v195_v48, %v75_v57  ;;  %v210_v8 = vadd.f32 %v209_v49, %v76_v58  ;;  %v2487_v48 = vor.u32 %v2799_v35, %v2484_v36  ;;  %v2615_v49 = vor.u32 %v2831_v40, %v2612_v41  ;;  %v2420_v35 = vld [vmem:[#allocation5 + $0x450] sm:$0xf0]  ;;  %v2815_v36 = vld [vmem:[#allocation5 + $0x544] sm:$0xf] }
  0xa0   :  { %v170_v52 = vadd.f32 %v169_v50, %v73_v44  ;;  %v184_v53 = vadd.f32 %v183_v51, %v74_v45  ;;  %v2196_v45 = vld [vmem:[#allocation5 + $0x290] sm:$0xf0]  ;;  %v2795_v50 = vld [vmem:[#allocation5 + $0x4a4] sm:$0xf] }
  0xa1   :  { %v244_v27 = vmax.f32 %v196_v7, 0.0  ;;  %v245_v28 = vmax.f32 %v210_v8, 0.0  ;;  %v2471_v5 = vor.u32 %v2795_v50, %v2468_v54  ;;  %v2791_v7 = vld [vmem:[#allocation5 + $0x484] sm:$0xf]  ;;  %v2452_v8 = vld [vmem:[#allocation5 + $0x490] sm:$0xf0] }
  0xa2   :  { %v248_v61 = vmax.f32 %v170_v52, 0.0  ;;  %v249_v62 = vmax.f32 %v184_v53, 0.0  ;;  %v2199_v52 = vor.u32 %v2727_v42, %v2196_v45  ;;  %v2327_v53 = vor.u32 %v2759_v46, %v2324_v47  ;;  %v2711_v42 = vld [vmem:[#allocation5 + $0x204] sm:$0xf]  ;;  %v2260_v45 = vld [vmem:[#allocation5 + $0x310] sm:$0xf0] }
  0xa3   :  { %v1994_v46 = vld [vmem:[#allocation5 + $0xe8] sm:$0xf]  ;;  %v2678_v47 = vld [vmem:[#allocation5 + $0xf4] sm:$0xf0]  ;;  %v2532_v54 = vld [vmem:[#allocation5 + $0x530] sm:$0xf0] }
  0xa4   :  { %v2982_v3 = vpack.c.bf16 %v248_v61, %v242_v59  ;;  %v2984_v4 = vpack.c.bf16 %v249_v62, %v243_v60  ;;  %v2723_v61 = vld [vmem:[#allocation5 + $0x264] sm:$0xf]  ;;  %v2180_v62 = vld [vmem:[#allocation5 + $0x270] sm:$0xf0]  ;;  %v2122_v50 = vld [vmem:[#allocation5 + $0x1e8] sm:$0xf] }
  0xa5   :  { %v2183_v13 = vor.u32 %v2723_v61, %v2180_v62  ;;  %v2106_v61 = vld [vmem:[#allocation5 + $0x1c8] sm:$0xf] }
  0xa6   :  { %v197_v9 = vpop.f32.mrf.mxu2  ;;  %v211_v10 = vpop.f32.mrf.mxu3  ;;  %1430 = vmatmul.bf16.vlgmr.msrb.gmra.mxu2 %v2982_v3  ;;  %1444 = vmatmul.bf16.vlgmr.msrb.gmra.mxu3 %v2984_v4 }
  0xa7   :  { %v198_v15 = vadd.f32 %v197_v9, %v75_v57  ;;  %v212_v16 = vadd.f32 %v211_v10, %v76_v58  ;;  %1534 = vmatpush.bf16.msrb.mxu2 %v2247_v63  ;;  %1548 = vmatpush.bf16.msrb.mxu3 %v2375_v0  ;;  %v223_v17 = vpop.f32.mrf.mxu0  ;;  %v237_v18 = vpop.f32.mrf.mxu1  ;;  %v2755_v63 = vld [vmem:[#allocation5 + $0x364] sm:$0xf]  ;;  %v2308_v0 = vld [vmem:[#allocation5 + $0x370] sm:$0xf0] }
  0xa8   :  { %v224_v43 = vadd.f32 %v223_v17, %v77_v23  ;;  %v238_v44 = vadd.f32 %v237_v18, %v78_v24  ;;  %v2823_v9 = vld [vmem:[#allocation5 + $0x584] sm:$0xf]  ;;  %v2580_v10 = vld [vmem:[#allocation5 + $0x590] sm:$0xf0]  ;;  %v2311_v14 = vor.u32 %v2755_v63, %v2308_v0  ;;  %v2706_v0 = vld [vmem:[#allocation5 + $0x1d4] sm:$0xf0] }
  0xa9   :  { %v250_v29 = vmax.f32 %v198_v15, 0.0  ;;  %v251_v30 = vmax.f32 %v212_v16, 0.0  ;;  %v2719_v15 = vld [vmem:[#allocation5 + $0x244] sm:$0xf]  ;;  %v2164_v16 = vld [vmem:[#allocation5 + $0x250] sm:$0xf0]  ;;  %v2583_v20 = vor.u32 %v2823_v9, %v2580_v10 }
  0xaa   :  { %v246_v57 = vmax.f32 %v224_v43, 0.0  ;;  %v247_v58 = vmax.f32 %v238_v44, 0.0  ;;  %v2751_v17 = vld [vmem:[#allocation5 + $0x344] sm:$0xf]  ;;  %v2292_v18 = vld [vmem:[#allocation5 + $0x350] sm:$0xf0]  ;;  %v2167_v25 = vor.u32 %v2719_v15, %v2164_v16 }
  0xab   :  { %v2990_v37 = vpack.c.bf16 %v250_v29, %v244_v27  ;;  %v2992_v38 = vpack.c.bf16 %v251_v30, %v245_v28  ;;  %1535 = vmatpush.bf16.msrb.mxu2 %v2231_v11  ;;  %1549 = vmatpush.bf16.msrb.mxu3 %v2359_v19  ;;  %v2455_v19 = vor.u32 %v2791_v7, %v2452_v8  ;;  %v2715_v27 = vld [vmem:[#allocation5 + $0x224] sm:$0xf]  ;;  %v2148_v28 = vld [vmem:[#allocation5 + $0x230] sm:$0xf0]  ;;  %v2250_v7 = vld [vmem:[#allocation5 + $0x2e8] sm:$0xf] }
  0xac   :  { %v2295_v26 = vor.u32 %v2751_v17, %v2292_v18  ;;  %v2747_v29 = vld [vmem:[#allocation5 + $0x324] sm:$0xf]  ;;  %v2276_v30 = vld [vmem:[#allocation5 + $0x330] sm:$0xf0]  ;;  %v2151_v40 = vor.u32 %v2715_v27, %v2148_v28  ;;  %v2742_v8 = vld [vmem:[#allocation5 + $0x2f4] sm:$0xf0] }
  0xad   :  { %1458 = vmatmul.bf16.vlgmr.msra.gmra.mxu0 %v2990_v37  ;;  %1472 = vmatmul.bf16.vlgmr.msra.gmra.mxu1 %v2992_v38  ;;  %v2279_v41 = vor.u32 %v2747_v29, %v2276_v30  ;;  %v2132_v43 = vld [vmem:[#allocation5 + $0x210] sm:$0xf0]  ;;  %v2743_v44 = vld [vmem:[#allocation5 + $0x304] sm:$0xf]  ;;  %v2378_v9 = vld [vmem:[#allocation5 + $0x3e8] sm:$0xf] }
  0xae   :  { %1562 = vmatpush.bf16.msra.mxu0 %v2503_v32  ;;  %1576 = vmatpush.bf16.msra.mxu1 %v2631_v33  ;;  %v2439_v32 = vor.u32 %v2787_v21, %v2436_v22  ;;  %v2135_v55 = vor.u32 %v2711_v42, %v2132_v43  ;;  %v2263_v56 = vor.u32 %v2743_v44, %v2260_v45  ;;  %v2774_v10 = vld [vmem:[#allocation5 + $0x3f4] sm:$0xf0]  ;;  %v1962_v15 = vld [vmem:[#allocation5 + $0xa8] sm:$0xf] }
  0xaf   :  { %1536 = vmatpush.bf16.msrb.mxu2 %v2215_v34  ;;  %1550 = vmatpush.bf16.msrb.mxu3 %v2343_v39  ;;  %v225_v51 = vpop.f32.mrf.mxu0  ;;  %v239_v31 = vpop.f32.mrf.mxu1  ;;  %v2783_v34 = vld [vmem:[#allocation5 + $0x444] sm:$0xf]  ;;  %v2548_v39 = vld [vmem:[#allocation5 + $0x550] sm:$0xf0]  ;;  %v2670_v18 = vld [vmem:[#allocation5 + $0xb4] sm:$0xf0]  ;;  %v2251_v21 = vor.u32 %v2742_v8, %v2250_v7  ;;  %v2379_v22 = vor.u32 %v2774_v10, %v2378_v9 }
  0xb0   :  { %v226_v59 = vadd.f32 %v225_v51, %v77_v23  ;;  %v240_v60 = vadd.f32 %v239_v31, %v78_v24  ;;  %v2819_v23 = vld [vmem:[#allocation5 + $0x564] sm:$0xf]  ;;  %v2564_v24 = vld [vmem:[#allocation5 + $0x570] sm:$0xf0]  ;;  %v2710_v51 = vld [vmem:[#allocation5 + $0x1f4] sm:$0xf0]  ;;  %v1963_v27 = vor.u32 %v2670_v18, %v1962_v15 }
  0xb1   :  { %v2567_v33 = vor.u32 %v2819_v23, %v2564_v24  ;;  %v2779_v31 = vld [vmem:[#allocation5 + $0x424] sm:$0xf]  ;;  %v2234_v23 = vld [vmem:[#allocation5 + $0x2c8] sm:$0xf]  ;;  %v2738_v24 = vld [vmem:[#allocation5 + $0x2d4] sm:$0xf0] }
  0xb2   :  { %v252_v1 = vmax.f32 %v226_v59, 0.0  ;;  %v253_v2 = vmax.f32 %v240_v60, 0.0  ;;  %1563 = vmatpush.bf16.msra.mxu0 %v2487_v48  ;;  %1577 = vmatpush.bf16.msra.mxu1 %v2615_v49  ;;  %v2423_v48 = vor.u32 %v2783_v34, %v2420_v35  ;;  %v2551_v49 = vor.u32 %v2815_v36, %v2548_v39  ;;  %v1978_v59 = vld [vmem:[#allocation5 + $0xc8] sm:$0xf]  ;;  %v2674_v60 = vld [vmem:[#allocation5 + $0xd4] sm:$0xf0] }
  0xb3   :  { %1537 = vmatpush.bf16.msrb.mxu2 %v2199_v52  ;;  %1551 = vmatpush.bf16.msrb.mxu3 %v2327_v53  ;;  %v2404_v52 = vld [vmem:[#allocation5 + $0x430] sm:$0xf0]  ;;  %v2811_v53 = vld [vmem:[#allocation5 + $0x524] sm:$0xf]  ;;  %v1946_v29 = vld [vmem:[#allocation5 + $0x88] sm:$0xf]  ;;  %v2235_v34 = vor.u32 %v2738_v24, %v2234_v23 }
  0xb4   :  { %v2996_v11 = vpack.c.bf16 %v252_v1, %v246_v57  ;;  %v2998_v12 = vpack.c.bf16 %v253_v2, %v247_v58  ;;  %v1995_v57 = vor.u32 %v2678_v47, %v1994_v46  ;;  %v2123_v58 = vor.u32 %v2710_v51, %v2122_v50  ;;  %v2775_v1 = vld [vmem:[#allocation5 + $0x404] sm:$0xf]  ;;  %v2388_v2 = vld [vmem:[#allocation5 + $0x410] sm:$0xf0]  ;;  %v2666_v30 = vld [vmem:[#allocation5 + $0x94] sm:$0xf0] }
  0xb5   :  { %v2407_v62 = vor.u32 %v2779_v31, %v2404_v52  ;;  %v2535_v63 = vor.u32 %v2811_v53, %v2532_v54  ;;  %v2391_v16 = vor.u32 %v2775_v1, %v2388_v2  ;;  %v2218_v36 = vld [vmem:[#allocation5 + $0x2a8] sm:$0xf]  ;;  %v2734_v39 = vld [vmem:[#allocation5 + $0x2b4] sm:$0xf0]  ;;  %v1947_v42 = vor.u32 %v2666_v30, %v1946_v29 }
  0xb6   :  { %1564 = vmatpush.bf16.msra.mxu0 %v2471_v5  ;;  %1578 = vmatpush.bf16.msra.mxu1 %v2599_v6  ;;  %v2807_v5 = vld [vmem:[#allocation5 + $0x504] sm:$0xf]  ;;  %v2516_v6 = vld [vmem:[#allocation5 + $0x510] sm:$0xf0]  ;;  %v1930_v44 = vld [vmem:[#allocation5 + $0x68] sm:$0xf] }
  0xb7   :  { %1486 = vmatmul.bf16.vlgmr.msra.gmra.mxu2 %v2996_v11  ;;  %1500 = vmatmul.bf16.vlgmr.msra.gmra.mxu3 %v2998_v12  ;;  %v2519_v17 = vor.u32 %v2807_v5, %v2516_v6  ;;  %v2662_v45 = vld [vmem:[#allocation5 + $0x74] sm:$0xf0]  ;;  %v2058_v46 = vld [vmem:[#allocation5 + $0x168] sm:$0xf] }
  0xb8   :  { %1538 = vmatpush.bf16.msrb.mxu2 %v2183_v13  ;;  %1552 = vmatpush.bf16.msrb.mxu3 %v2311_v14  ;;  %v1979_v13 = vor.u32 %v2674_v60, %v1978_v59  ;;  %v2107_v14 = vor.u32 %v2706_v0, %v2106_v61  ;;  %v2694_v47 = vld [vmem:[#allocation5 + $0x174] sm:$0xf0]  ;;  %v2202_v50 = vld [vmem:[#allocation5 + $0x288] sm:$0xf]  ;;  %v1931_v53 = vor.u32 %v2662_v45, %v1930_v44 }
  0xb9   :  { %v2730_v51 = vld [vmem:[#allocation5 + $0x294] sm:$0xf0]  ;;  %v2330_v31 = vld [vmem:[#allocation5 + $0x388] sm:$0xf]  ;;  %v2059_v54 = vor.u32 %v2694_v47, %v2058_v46 }
  0xba   :  { %1565 = vmatpush.bf16.msra.mxu0 %v2455_v19  ;;  %1579 = vmatpush.bf16.msra.mxu1 %v2583_v20  ;;  %v2090_v19 = vld [vmem:[#allocation5 + $0x1a8] sm:$0xf]  ;;  %v2702_v20 = vld [vmem:[#allocation5 + $0x1b4] sm:$0xf0]  ;;  %v2203_v59 = vor.u32 %v2730_v51, %v2202_v50  ;;  %v2676_v50 = vld [vmem:[#allocation5 + $0xec] sm:$0xf] }
  0xbb   :  { %v2091_v28 = vor.u32 %v2702_v20, %v2090_v19  ;;  %v2762_v52 = vld [vmem:[#allocation5 + $0x394] sm:$0xf0]  ;;  %v2186_v61 = vld [vmem:[#allocation5 + $0x268] sm:$0xf]  ;;  %v1996_v51 = vld [vmem:[#allocation5 + $0xf8] sm:$0xf0] }
  0xbc   :  { %1539 = vmatpush.bf16.msrb.mxu2 %v2167_v25  ;;  %1553 = vmatpush.bf16.msrb.mxu3 %v2295_v26  ;;  %v2362_v25 = vld [vmem:[#allocation5 + $0x3c8] sm:$0xf]  ;;  %v2770_v26 = vld [vmem:[#allocation5 + $0x3d4] sm:$0xf0]  ;;  %v2331_v60 = vor.u32 %v2762_v52, %v2330_v31  ;;  %v2708_v31 = vld [vmem:[#allocation5 + $0x1ec] sm:$0xf] }
  0xbd   :  { %1514 = vmatmul.bf16.vlgmr.msrb.gmra.mxu0 %v2982_v3  ;;  %1528 = vmatmul.bf16.vlgmr.msrb.gmra.mxu1 %v2984_v4  ;;  %v2363_v35 = vor.u32 %v2770_v26, %v2362_v25  ;;  %v2758_v0 = vld [vmem:[#allocation5 + $0x374] sm:$0xf0]  ;;  %v1898_v5 = vld [vmem:[#allocation5 + $0x28] sm:$0xf]  ;;  %v2124_v52 = vld [vmem:[#allocation5 + $0x1f8] sm:$0xf0] }
  0xbe   :  { %1566 = vmatpush.bf16.msra.mxu0 %v2439_v32  ;;  %1580 = vmatpush.bf16.msra.mxu1 %v2567_v33  ;;  %v2074_v32 = vld [vmem:[#allocation5 + $0x188] sm:$0xf]  ;;  %v2698_v33 = vld [vmem:[#allocation5 + $0x194] sm:$0xf0] }
  0xbf   :  { %v2075_v43 = vor.u32 %v2698_v33, %v2074_v32  ;;  %v2654_v6 = vld [vmem:[#allocation5 + $0x34] sm:$0xf0]  ;;  %v2026_v7 = vld [vmem:[#allocation5 + $0x128] sm:$0xf] }
  0xc0   :  { %1540 = vmatpush.bf16.msrb.mxu2 %v2151_v40  ;;  %1554 = vmatpush.bf16.msrb.mxu3 %v2279_v41  ;;  %v2346_v40 = vld [vmem:[#allocation5 + $0x3a8] sm:$0xf]  ;;  %v2766_v41 = vld [vmem:[#allocation5 + $0x3b4] sm:$0xf0] }
  0xc1   :  { %v2686_v8 = vld [vmem:[#allocation5 + $0x134] sm:$0xf0]  ;;  %v2298_v15 = vld [vmem:[#allocation5 + $0x348] sm:$0xf] }
  0xc2   :  { %1567 = vmatpush.bf16.msra.mxu0 %v2423_v48  ;;  %1581 = vmatpush.bf16.msra.mxu1 %v2551_v49  ;;  %v2219_v48 = vor.u32 %v2734_v39, %v2218_v36  ;;  %v2347_v49 = vor.u32 %v2766_v41, %v2346_v40  ;;  %v2027_v18 = vor.u32 %v2686_v8, %v2026_v7  ;;  %v1882_v19 = vld [vmem:[#allocation5 + $0x8] sm:$0xf]  ;;  %v2650_v20 = vld [vmem:[#allocation5 + $0x14] sm:$0xf0] }
  0xc3   :  { %v2506_v23 = vld [vmem:[#allocation5 + $0x4e8] sm:$0xf]  ;;  %v2806_v24 = vld [vmem:[#allocation5 + $0x4f4] sm:$0xf0] }
  0xc4   :  { %1541 = vmatpush.bf16.msrb.mxu2 %v2135_v55  ;;  %1555 = vmatpush.bf16.msrb.mxu3 %v2263_v56  ;;  %v1914_v55 = vld [vmem:[#allocation5 + $0x48] sm:$0xf]  ;;  %v2658_v56 = vld [vmem:[#allocation5 + $0x54] sm:$0xf0]  ;;  %v2507_v36 = vor.u32 %v2806_v24, %v2506_v23 }
  0xc5   :  { %v1915_v1 = vor.u32 %v2658_v56, %v1914_v55  ;;  %v2154_v29 = vld [vmem:[#allocation5 + $0x228] sm:$0xf]  ;;  %v2718_v30 = vld [vmem:[#allocation5 + $0x234] sm:$0xf0] }
  0xc6   :  { %1568 = vmatpush.bf16.msra.mxu0 %v2407_v62  ;;  %1582 = vmatpush.bf16.msra.mxu1 %v2535_v63  ;;  %v2726_v62 = vld [vmem:[#allocation5 + $0x274] sm:$0xf0]  ;;  %v2314_v63 = vld [vmem:[#allocation5 + $0x368] sm:$0xf] }
  0xc7   :  { %1542 = vmatmul.bf16.vlgmr.msrb.gmra.mxu2 %v2990_v37  ;;  %1556 = vmatmul.bf16.vlgmr.msrb.gmra.mxu3 %v2992_v38  ;;  %v2187_v9 = vor.u32 %v2726_v62, %v2186_v61  ;;  %v2315_v10 = vor.u32 %v2758_v0, %v2314_v63  ;;  %v2282_v32 = vld [vmem:[#allocation5 + $0x328] sm:$0xf]  ;;  %v2750_v33 = vld [vmem:[#allocation5 + $0x334] sm:$0xf0]  ;;  %v2672_v63 = vld [vmem:[#allocation5 + $0xcc] sm:$0xf] }
  0xc8   :  { %1590 = vmatpush.bf16.msra.mxu2 %v1995_v57  ;;  %1604 = vmatpush.bf16.msra.mxu3 %v2123_v58  ;;  %v2042_v57 = vld [vmem:[#allocation5 + $0x148] sm:$0xf]  ;;  %v2690_v58 = vld [vmem:[#allocation5 + $0x154] sm:$0xf0]  ;;  %v2283_v44 = vor.u32 %v2750_v33, %v2282_v32  ;;  %v1980_v0 = vld [vmem:[#allocation5 + $0xd8] sm:$0xf0] }
  0xc9   :  { %v2043_v2 = vor.u32 %v2690_v58, %v2042_v57  ;;  %v2490_v40 = vld [vmem:[#allocation5 + $0x4c8] sm:$0xf]  ;;  %v2802_v41 = vld [vmem:[#allocation5 + $0x4d4] sm:$0xf0] }
  0xca   :  { %1569 = vmatpush.bf16.msra.mxu0 %v2391_v16  ;;  %1583 = vmatpush.bf16.msra.mxu1 %v2519_v17  ;;  %v2754_v16 = vld [vmem:[#allocation5 + $0x354] sm:$0xf0]  ;;  %v1899_v17 = vor.u32 %v2654_v6, %v1898_v5  ;;  %v2138_v46 = vld [vmem:[#allocation5 + $0x208] sm:$0xf] }
  0xcb   :  { %v2299_v26 = vor.u32 %v2754_v16, %v2298_v15  ;;  %v2834_v45 = vld [vmem:[#allocation5 + $0x5d4] sm:$0xf0]  ;;  %v2474_v57 = vld [vmem:[#allocation5 + $0x4a8] sm:$0xf]  ;;  %v2668_v15 = vld [vmem:[#allocation5 + $0xac] sm:$0xf] }
  0xcc   :  { %1591 = vmatpush.bf16.msra.mxu2 %v1979_v13  ;;  %1605 = vmatpush.bf16.msra.mxu3 %v2107_v14  ;;  %v2170_v13 = vld [vmem:[#allocation5 + $0x248] sm:$0xf]  ;;  %v2722_v14 = vld [vmem:[#allocation5 + $0x254] sm:$0xf0]  ;;  %v1964_v16 = vld [vmem:[#allocation5 + $0xb8] sm:$0xf0] }
  0xcd   :  { %1570 = vmatmul.bf16.vlgmr.msra.gmra.mxu0 %v2996_v11  ;;  %1584 = vmatmul.bf16.vlgmr.msra.gmra.mxu1 %v2998_v12  ;;  %v2171_v25 = vor.u32 %v2722_v14, %v2170_v13  ;;  %v2714_v47 = vld [vmem:[#allocation5 + $0x214] sm:$0xf0]  ;;  %v2602_v61 = vld [vmem:[#allocation5 + $0x5a8] sm:$0xf]  ;;  %v1967_v23 = vor.u32 %v2668_v15, %v1964_v16 }
  0xce   :  { %1618 = vmatpush.bf16.msrb.mxu0 %v2251_v21  ;;  %1632 = vmatpush.bf16.msrb.mxu1 %v2379_v22  ;;  %v2010_v21 = vld [vmem:[#allocation5 + $0x108] sm:$0xf]  ;;  %v2682_v22 = vld [vmem:[#allocation5 + $0x114] sm:$0xf0]  ;;  %v2139_v55 = vor.u32 %v2714_v47, %v2138_v46 }
  0xcf   :  { %v2798_v58 = vld [vmem:[#allocation5 + $0x4b4] sm:$0xf0]  ;;  %v2458_v7 = vld [vmem:[#allocation5 + $0x488] sm:$0xf] }
  0xd0   :  { %1592 = vmatpush.bf16.msra.mxu2 %v1963_v27  ;;  %1606 = vmatpush.bf16.msra.mxu3 %v2091_v28  ;;  %v2634_v27 = vld [vmem:[#allocation5 + $0x5e8] sm:$0xf]  ;;  %v2838_v28 = vld [vmem:[#allocation5 + $0x5f4] sm:$0xf0]  ;;  %v2475_v5 = vor.u32 %v2798_v58, %v2474_v57 }
  0xd1   :  { %v2635_v39 = vor.u32 %v2838_v28, %v2634_v27  ;;  %v2830_v62 = vld [vmem:[#allocation5 + $0x5b4] sm:$0xf0]  ;;  %v2586_v13 = vld [vmem:[#allocation5 + $0x588] sm:$0xf]  ;;  %v2664_v27 = vld [vmem:[#allocation5 + $0x8c] sm:$0xf] }
  0xd2   :  { %1619 = vmatpush.bf16.msrb.mxu0 %v2235_v34  ;;  %1633 = vmatpush.bf16.msrb.mxu1 %v2363_v35  ;;  %v1883_v34 = vor.u32 %v2650_v20, %v1882_v19  ;;  %v2011_v35 = vor.u32 %v2682_v22, %v2010_v21  ;;  %v2603_v6 = vor.u32 %v2830_v62, %v2602_v61  ;;  %v2794_v8 = vld [vmem:[#allocation5 + $0x494] sm:$0xf0]  ;;  %v2442_v21 = vld [vmem:[#allocation5 + $0x468] sm:$0xf]  ;;  %v1948_v28 = vld [vmem:[#allocation5 + $0x98] sm:$0xf0] }
  0xd3   :  { %v2826_v14 = vld [vmem:[#allocation5 + $0x594] sm:$0xf0]  ;;  %v2459_v19 = vor.u32 %v2794_v8, %v2458_v7  ;;  %v2522_v61 = vld [vmem:[#allocation5 + $0x508] sm:$0xf]  ;;  %v2652_v7 = vld [vmem:[#allocation5 + $0x2c] sm:$0xf] }
  0xd4   :  { %1593 = vmatpush.bf16.msra.mxu2 %v1947_v42  ;;  %1607 = vmatpush.bf16.msra.mxu3 %v2075_v43  ;;  %v2618_v42 = vld [vmem:[#allocation5 + $0x5c8] sm:$0xf]  ;;  %v2155_v43 = vor.u32 %v2718_v30, %v2154_v29  ;;  %v2587_v20 = vor.u32 %v2826_v14, %v2586_v13  ;;  %v2790_v22 = vld [vmem:[#allocation5 + $0x474] sm:$0xf0]  ;;  %v2696_v29 = vld [vmem:[#allocation5 + $0x18c] sm:$0xf] }
  0xd5   :  { %v2076_v30 = vld [vmem:[#allocation5 + $0x198] sm:$0xf0]  ;;  %v2443_v32 = vor.u32 %v2790_v22, %v2442_v21 }
  0xd6   :  { %1620 = vmatpush.bf16.msrb.mxu0 %v2219_v48  ;;  %1634 = vmatpush.bf16.msrb.mxu1 %v2347_v49  ;;  %v2266_v48 = vld [vmem:[#allocation5 + $0x308] sm:$0xf]  ;;  %v2746_v49 = vld [vmem:[#allocation5 + $0x314] sm:$0xf0]  ;;  %v1900_v8 = vld [vmem:[#allocation5 + $0x38] sm:$0xf0] }
  0xd7   :  { %v2267_v56 = vor.u32 %v2746_v49, %v2266_v48  ;;  %v2410_v48 = vld [vmem:[#allocation5 + $0x428] sm:$0xf]  ;;  %v2782_v49 = vld [vmem:[#allocation5 + $0x434] sm:$0xf0]  ;;  %v2364_v22 = vld [vmem:[#allocation5 + $0x3d8] sm:$0xf0] }
  0xd8   :  { %1594 = vmatpush.bf16.msra.mxu2 %v1931_v53  ;;  %1608 = vmatpush.bf16.msra.mxu3 %v2059_v54  ;;  %v2491_v53 = vor.u32 %v2802_v41, %v2490_v40  ;;  %v2619_v54 = vor.u32 %v2834_v45, %v2618_v42  ;;  %v2554_v40 = vld [vmem:[#allocation5 + $0x548] sm:$0xf]  ;;  %v2818_v41 = vld [vmem:[#allocation5 + $0x554] sm:$0xf0]  ;;  %v2660_v42 = vld [vmem:[#allocation5 + $0x6c] sm:$0xf]  ;;  %v2411_v57 = vor.u32 %v2782_v49, %v2410_v48 }
  0xd9   :  { %v2060_v45 = vld [vmem:[#allocation5 + $0x178] sm:$0xf0]  ;;  %v2555_v47 = vor.u32 %v2818_v41, %v2554_v40 }
  0xda   :  { %1621 = vmatpush.bf16.msrb.mxu0 %v2203_v59  ;;  %1635 = vmatpush.bf16.msrb.mxu1 %v2331_v60  ;;  %v1999_v59 = vor.u32 %v2676_v50, %v1996_v51  ;;  %v2127_v60 = vor.u32 %v2708_v31, %v2124_v52  ;;  %v2538_v31 = vld [vmem:[#allocation5 + $0x528] sm:$0xf]  ;;  %v2814_v52 = vld [vmem:[#allocation5 + $0x534] sm:$0xf0] }
  0xdb   :  { %v2539_v58 = vor.u32 %v2814_v52, %v2538_v31 }
  0xdc   :  { %1595 = vmatpush.bf16.msra.mxu2 %v1915_v1  ;;  %1609 = vmatpush.bf16.msra.mxu3 %v2043_v2  ;;  %v2704_v1 = vld [vmem:[#allocation5 + $0x1cc] sm:$0xf]  ;;  %v2108_v2 = vld [vmem:[#allocation5 + $0x1d8] sm:$0xf0] }
  0xde   :  { %1622 = vmatpush.bf16.msrb.mxu0 %v2187_v9  ;;  %1636 = vmatpush.bf16.msrb.mxu1 %v2315_v10  ;;  %v1983_v9 = vor.u32 %v2672_v63, %v1980_v0  ;;  %v2111_v10 = vor.u32 %v2704_v1, %v2108_v2  ;;  %v2810_v0 = vld [vmem:[#allocation5 + $0x514] sm:$0xf0]  ;;  %v2740_v1 = vld [vmem:[#allocation5 + $0x2ec] sm:$0xf]  ;;  %v2252_v2 = vld [vmem:[#allocation5 + $0x2f8] sm:$0xf0] }
  0xdf   :  { %v2523_v14 = vor.u32 %v2810_v0, %v2522_v61  ;;  %v2255_v15 = vor.u32 %v2740_v1, %v2252_v2  ;;  %v2724_v61 = vld [vmem:[#allocation5 + $0x26c] sm:$0xf]  ;;  %v2316_v2 = vld [vmem:[#allocation5 + $0x378] sm:$0xf0] }
  0xe0   :  { %1596 = vmatpush.bf16.msra.mxu2 %v1899_v17  ;;  %1610 = vmatpush.bf16.msra.mxu3 %v2027_v18  ;;  %v2700_v17 = vld [vmem:[#allocation5 + $0x1ac] sm:$0xf]  ;;  %v2092_v18 = vld [vmem:[#allocation5 + $0x1b8] sm:$0xf0] }
  0xe1   :  { %v2095_v24 = vor.u32 %v2700_v17, %v2092_v18  ;;  %v2736_v17 = vld [vmem:[#allocation5 + $0x2cc] sm:$0xf]  ;;  %v2236_v18 = vld [vmem:[#allocation5 + $0x2d8] sm:$0xf0] }
  0xe2   :  { %1623 = vmatpush.bf16.msrb.mxu0 %v2171_v25  ;;  %1637 = vmatpush.bf16.msrb.mxu1 %v2299_v26  ;;  %v2570_v25 = vld [vmem:[#allocation5 + $0x568] sm:$0xf]  ;;  %v2822_v26 = vld [vmem:[#allocation5 + $0x574] sm:$0xf0]  ;;  %v2756_v1 = vld [vmem:[#allocation5 + $0x36c] sm:$0xf] }
  0xe3   :  { %v2571_v33 = vor.u32 %v2822_v26, %v2570_v25  ;;  %v2680_v25 = vld [vmem:[#allocation5 + $0x10c] sm:$0xf]  ;;  %v2012_v26 = vld [vmem:[#allocation5 + $0x118] sm:$0xf0] }
  0xe4   :  { %1597 = vmatpush.bf16.msra.mxu2 %v1883_v34  ;;  %1611 = vmatpush.bf16.msra.mxu3 %v2011_v35  ;;  %v2426_v34 = vld [vmem:[#allocation5 + $0x448] sm:$0xf]  ;;  %v2786_v35 = vld [vmem:[#allocation5 + $0x454] sm:$0xf0] }
  0xe5   :  { %v2427_v46 = vor.u32 %v2786_v35, %v2426_v34  ;;  %v2015_v35 = vor.u32 %v2680_v25, %v2012_v26 }
  0xe6   :  { %1624 = vmatpush.bf16.msrb.mxu0 %v2155_v43  ;;  %1638 = vmatpush.bf16.msrb.mxu1 %v2283_v44  ;;  %v1932_v43 = vld [vmem:[#allocation5 + $0x78] sm:$0xf0]  ;;  %v2692_v44 = vld [vmem:[#allocation5 + $0x16c] sm:$0xf] }
  0xe7   :  { %1598 = vmatmul.bf16.vlgmr.msra.gmra.mxu2 %v2982_v3  ;;  %1612 = vmatmul.bf16.vlgmr.msra.gmra.mxu3 %v2984_v4  ;;  %v1935_v50 = vor.u32 %v2660_v42, %v1932_v43  ;;  %v2063_v51 = vor.u32 %v2692_v44, %v2060_v45  ;;  %v2764_v42 = vld [vmem:[#allocation5 + $0x3ac] sm:$0xf]  ;;  %v2348_v43 = vld [vmem:[#allocation5 + $0x3b8] sm:$0xf0] }
  0xe8   :  { %1646 = vmatpush.bf16.msrb.mxu2 %v2507_v36  ;;  %1660 = vmatpush.bf16.msrb.mxu3 %v2635_v39  ;;  %v1951_v36 = vor.u32 %v2664_v27, %v1948_v28  ;;  %v2079_v39 = vor.u32 %v2696_v29, %v2076_v30  ;;  %v2804_v27 = vld [vmem:[#allocation5 + $0x4ec] sm:$0xf]  ;;  %v2508_v28 = vld [vmem:[#allocation5 + $0x4f8] sm:$0xf0]  ;;  %v2351_v49 = vor.u32 %v2764_v42, %v2348_v43 }
  0xe9   :  { %v2836_v29 = vld [vmem:[#allocation5 + $0x5ec] sm:$0xf]  ;;  %v2636_v30 = vld [vmem:[#allocation5 + $0x5f8] sm:$0xf0]  ;;  %v2511_v40 = vor.u32 %v2804_v27, %v2508_v28 }
  0xea   :  { %1625 = vmatpush.bf16.msrb.mxu0 %v2139_v55  ;;  %1639 = vmatpush.bf16.msrb.mxu1 %v2267_v56  ;;  %v2688_v55 = vld [vmem:[#allocation5 + $0x14c] sm:$0xf]  ;;  %v2044_v56 = vld [vmem:[#allocation5 + $0x158] sm:$0xf0]  ;;  %v2639_v41 = vor.u32 %v2836_v29, %v2636_v30 }
  0xeb   :  { %v2047_v63 = vor.u32 %v2688_v55, %v2044_v56  ;;  %v2800_v44 = vld [vmem:[#allocation5 + $0x4cc] sm:$0xf]  ;;  %v2492_v45 = vld [vmem:[#allocation5 + $0x4d8] sm:$0xf0] }
  0xec   :  { %1647 = vmatpush.bf16.msrb.mxu2 %v2491_v53  ;;  %1661 = vmatpush.bf16.msrb.mxu3 %v2619_v54  ;;  %v2656_v53 = vld [vmem:[#allocation5 + $0x4c] sm:$0xf]  ;;  %v1916_v54 = vld [vmem:[#allocation5 + $0x58] sm:$0xf0]  ;;  %v2495_v31 = vor.u32 %v2800_v44, %v2492_v45 }
  0xed   :  { %1626 = vmatmul.bf16.vlgmr.msrb.gmra.mxu0 %v2990_v37  ;;  %1640 = vmatmul.bf16.vlgmr.msrb.gmra.mxu1 %v2992_v38  ;;  %v1919_v62 = vor.u32 %v2656_v53, %v1916_v54  ;;  %v2760_v53 = vld [vmem:[#allocation5 + $0x38c] sm:$0xf]  ;;  %v2332_v54 = vld [vmem:[#allocation5 + $0x398] sm:$0xf0] }
  0xee   :  { %1674 = vmatpush.bf16.msra.mxu0 %v1999_v59  ;;  %1688 = vmatpush.bf16.msra.mxu1 %v2127_v60  ;;  %v2394_v59 = vld [vmem:[#allocation5 + $0x408] sm:$0xf]  ;;  %v2778_v60 = vld [vmem:[#allocation5 + $0x414] sm:$0xf0]  ;;  %v2796_v55 = vld [vmem:[#allocation5 + $0x4ac] sm:$0xf] }
  0xef   :  { %v2395_v13 = vor.u32 %v2778_v60, %v2394_v59  ;;  %v2476_v56 = vld [vmem:[#allocation5 + $0x4b8] sm:$0xf0]  ;;  %v2335_v60 = vor.u32 %v2760_v53, %v2332_v54  ;;  %v2748_v27 = vld [vmem:[#allocation5 + $0x32c] sm:$0xf] }
  0xf0   :  { %1648 = vmatpush.bf16.msrb.mxu2 %v2475_v5  ;;  %1662 = vmatpush.bf16.msrb.mxu3 %v2603_v6  ;;  %v2772_v5 = vld [vmem:[#allocation5 + $0x3ec] sm:$0xf]  ;;  %v2380_v6 = vld [vmem:[#allocation5 + $0x3f8] sm:$0xf0] }
  0xf1   :  { %v2383_v16 = vor.u32 %v2772_v5, %v2380_v6  ;;  %v2792_v5 = vld [vmem:[#allocation5 + $0x48c] sm:$0xf]  ;;  %v2460_v6 = vld [vmem:[#allocation5 + $0x498] sm:$0xf0] }
  0xf2   :  { %1675 = vmatpush.bf16.msra.mxu0 %v1983_v9  ;;  %1689 = vmatpush.bf16.msra.mxu1 %v2111_v10  ;;  %v2684_v9 = vld [vmem:[#allocation5 + $0x12c] sm:$0xf]  ;;  %v2028_v10 = vld [vmem:[#allocation5 + $0x138] sm:$0xf0] }
  0xf3   :  { %v2031_v21 = vor.u32 %v2684_v9, %v2028_v10  ;;  %v2720_v9 = vld [vmem:[#allocation5 + $0x24c] sm:$0xf]  ;;  %v2172_v10 = vld [vmem:[#allocation5 + $0x258] sm:$0xf0] }
  0xf4   :  { %1649 = vmatpush.bf16.msrb.mxu2 %v2459_v19  ;;  %1663 = vmatpush.bf16.msrb.mxu3 %v2587_v20  ;;  %v2768_v19 = vld [vmem:[#allocation5 + $0x3cc] sm:$0xf]  ;;  %v1903_v20 = vor.u32 %v2652_v7, %v1900_v8  ;;  %v2588_v8 = vld [vmem:[#allocation5 + $0x598] sm:$0xf0] }
  0xf5   :  { %v2824_v7 = vld [vmem:[#allocation5 + $0x58c] sm:$0xf]  ;;  %v2284_v28 = vld [vmem:[#allocation5 + $0x338] sm:$0xf0] }
  0xf6   :  { %1676 = vmatpush.bf16.msra.mxu0 %v1967_v23  ;;  %1690 = vmatpush.bf16.msra.mxu1 %v2095_v24  ;;  %v2648_v23 = vld [vmem:[#allocation5 + $0xc] sm:$0xf]  ;;  %v1884_v24 = vld [vmem:[#allocation5 + $0x18] sm:$0xf0] }
  0xf7   :  { %v1887_v34 = vor.u32 %v2648_v23, %v1884_v24  ;;  %v2716_v23 = vld [vmem:[#allocation5 + $0x22c] sm:$0xf]  ;;  %v2156_v24 = vld [vmem:[#allocation5 + $0x238] sm:$0xf0] }
  0xf8   :  { %1650 = vmatpush.bf16.msrb.mxu2 %v2443_v32  ;;  %1664 = vmatpush.bf16.msrb.mxu3 %v2571_v33  ;;  %v2239_v32 = vor.u32 %v2736_v17, %v2236_v18  ;;  %v2367_v33 = vor.u32 %v2768_v19, %v2364_v22  ;;  %v2788_v17 = vld [vmem:[#allocation5 + $0x46c] sm:$0xf]  ;;  %v2444_v18 = vld [vmem:[#allocation5 + $0x478] sm:$0xf0] }
  0xf9   :  { %v2820_v19 = vld [vmem:[#allocation5 + $0x56c] sm:$0xf]  ;;  %v2447_v25 = vor.u32 %v2788_v17, %v2444_v18  ;;  %v2428_v30 = vld [vmem:[#allocation5 + $0x458] sm:$0xf0] }
  0xfa   :  { %1677 = vmatpush.bf16.msra.mxu0 %v1951_v36  ;;  %1691 = vmatpush.bf16.msra.mxu1 %v2079_v39  ;;  %v2732_v36 = vld [vmem:[#allocation5 + $0x2ac] sm:$0xf]  ;;  %v2220_v39 = vld [vmem:[#allocation5 + $0x2b8] sm:$0xf0] }
  0xfb   :  { %v2223_v48 = vor.u32 %v2732_v36, %v2220_v39  ;;  %v2784_v29 = vld [vmem:[#allocation5 + $0x44c] sm:$0xf]  ;;  %v2140_v39 = vld [vmem:[#allocation5 + $0x218] sm:$0xf0] }
  0xfc   :  { %1651 = vmatpush.bf16.msrb.mxu2 %v2427_v46  ;;  %1665 = vmatpush.bf16.msrb.mxu3 %v2555_v47  ;;  %v2832_v46 = vld [vmem:[#allocation5 + $0x5cc] sm:$0xf]  ;;  %v2620_v47 = vld [vmem:[#allocation5 + $0x5d8] sm:$0xf0] }
  0xfd   :  { %v2623_v52 = vor.u32 %v2832_v46, %v2620_v47  ;;  %v2712_v36 = vld [vmem:[#allocation5 + $0x20c] sm:$0xf]  ;;  %v2268_v43 = vld [vmem:[#allocation5 + $0x318] sm:$0xf0] }
  0xfe   :  { %1678 = vmatpush.bf16.msra.mxu0 %v1935_v50  ;;  %1692 = vmatpush.bf16.msra.mxu1 %v2063_v51  ;;  %v2728_v50 = vld [vmem:[#allocation5 + $0x28c] sm:$0xf]  ;;  %v2204_v51 = vld [vmem:[#allocation5 + $0x298] sm:$0xf0] }
  0xff   :  { %v2207_v59 = vor.u32 %v2728_v50, %v2204_v51  ;;  %v2744_v42 = vld [vmem:[#allocation5 + $0x30c] sm:$0xf]  ;;  %v2412_v45 = vld [vmem:[#allocation5 + $0x438] sm:$0xf0] }
 0x100   :  { %1652 = vmatpush.bf16.msrb.mxu2 %v2411_v57  ;;  %1666 = vmatpush.bf16.msrb.mxu3 %v2539_v58  ;;  %v2828_v57 = vld [vmem:[#allocation5 + $0x5ac] sm:$0xf]  ;;  %v2604_v58 = vld [vmem:[#allocation5 + $0x5b8] sm:$0xf0] }
 0x101   :  { %v2607_v0 = vor.u32 %v2828_v57, %v2604_v58  ;;  %v2780_v44 = vld [vmem:[#allocation5 + $0x42c] sm:$0xf]  ;;  %v2540_v47 = vld [vmem:[#allocation5 + $0x538] sm:$0xf0]  ;;  %v3021_v57 = vld [vmem:[%s3048_s4] sm:$0xf] }
 0x102   :  { %1679 = vmatpush.bf16.msra.mxu0 %v1919_v62  ;;  %1693 = vmatpush.bf16.msra.mxu1 %v2047_v63  ;;  %v2188_v62 = vld [vmem:[#allocation5 + $0x278] sm:$0xf0]  ;;  %v2479_v63 = vor.u32 %v2796_v55, %v2476_v56  ;;  %v2812_v46 = vld [vmem:[#allocation5 + $0x52c] sm:$0xf]  ;;  %v2415_v50 = vor.u32 %v2780_v44, %v2412_v45  ;;  %v454_v58 = vperm.slane %v3021_v57, 0 }
 0x103   :  { %v2543_v51 = vor.u32 %v2812_v46, %v2540_v47  ;;  %v2808_v53 = vld [vmem:[#allocation5 + $0x50c] sm:$0xf]  ;;  %v2524_v54 = vld [vmem:[#allocation5 + $0x518] sm:$0xf0] }
 0x104   :  { %1653 = vmatpush.bf16.msrb.mxu2 %v2395_v13  ;;  %1667 = vmatpush.bf16.msrb.mxu3 %v2523_v14  ;;  %v2463_v13 = vor.u32 %v2792_v5, %v2460_v6  ;;  %v2591_v14 = vor.u32 %v2824_v7, %v2588_v8  ;;  %v2527_v56 = vor.u32 %v2808_v53, %v2524_v54 }
 0x106   :  { %1680 = vmatpush.bf16.msra.mxu0 %v1903_v20  ;;  %1694 = vmatpush.bf16.msra.mxu1 %v2031_v21  ;;  %v2572_v20 = vld [vmem:[#allocation5 + $0x578] sm:$0xf0]  ;;  %v2175_v21 = vor.u32 %v2720_v9, %v2172_v10 }
 0x107   :  { %1654 = vmatmul.bf16.vlgmr.msrb.gmra.mxu2 %v2996_v11  ;;  %1668 = vmatmul.bf16.vlgmr.msrb.gmra.mxu3 %v2998_v12  ;;  %v2575_v26 = vor.u32 %v2820_v19, %v2572_v20 }
 0x108   :  { %1702 = vmatpush.bf16.msra.mxu2 %v2255_v15  ;;  %1716 = vmatpush.bf16.msra.mxu3 %v2383_v16  ;;  %v2752_v15 = vld [vmem:[#allocation5 + $0x34c] sm:$0xf]  ;;  %v2300_v16 = vld [vmem:[#allocation5 + $0x358] sm:$0xf0] }
 0x109   :  { %v2303_v22 = vor.u32 %v2752_v15, %v2300_v16 }
 0x10a   :  { %1681 = vmatpush.bf16.msra.mxu0 %v1887_v34  ;;  %1695 = vmatpush.bf16.msra.mxu1 %v2015_v35  ;;  %v2159_v34 = vor.u32 %v2716_v23, %v2156_v24  ;;  %v2287_v35 = vor.u32 %v2748_v27, %v2284_v28 }
 0x10c   :  { %1703 = vmatpush.bf16.msra.mxu2 %v2239_v32  ;;  %1717 = vmatpush.bf16.msra.mxu3 %v2367_v33  ;;  %v2816_v32 = vld [vmem:[#allocation5 + $0x54c] sm:$0xf]  ;;  %v2556_v33 = vld [vmem:[#allocation5 + $0x558] sm:$0xf0] }
 0x10d   :  { %1682 = vmatmul.bf16.vlgmr.msra.gmra.mxu0 %v2982_v3  ;;  %1696 = vmatmul.bf16.vlgmr.msra.gmra.mxu1 %v2984_v4  ;;  %v2191_v3 = vor.u32 %v2724_v61, %v2188_v62  ;;  %v2319_v4 = vor.u32 %v2756_v1, %v2316_v2 }
 0x10e   :  { %1730 = vmatpush.bf16.msrb.mxu0 %v2511_v40  ;;  %1744 = vmatpush.bf16.msrb.mxu1 %v2639_v41  ;;  %v2431_v40 = vor.u32 %v2784_v29, %v2428_v30  ;;  %v2559_v41 = vor.u32 %v2816_v32, %v2556_v33 }
 0x110   :  { %1704 = vmatpush.bf16.msra.mxu2 %v2223_v48  ;;  %1718 = vmatpush.bf16.msra.mxu3 %v2351_v49  ;;  %v2143_v48 = vor.u32 %v2712_v36, %v2140_v39  ;;  %v2271_v49 = vor.u32 %v2744_v42, %v2268_v43  ;;  %v455_v36 = vperm.slane %v3021_v57, 1  ;;  %v456_v39 = vperm.slane %v3021_v57, 2 }
 0x112   :  { %1731 = vmatpush.bf16.msrb.mxu0 %v2495_v31  ;;  %1745 = vmatpush.bf16.msrb.mxu1 %v2623_v52  ;;  %v2776_v31 = vld [vmem:[#allocation5 + $0x40c] sm:$0xf]  ;;  %v2396_v52 = vld [vmem:[#allocation5 + $0x418] sm:$0xf0] }
 0x113   :  { %v2399_v55 = vor.u32 %v2776_v31, %v2396_v52 }
 0x114   :  { %1705 = vmatpush.bf16.msra.mxu2 %v2207_v59  ;;  %1719 = vmatpush.bf16.msra.mxu3 %v2335_v60 }
 0x116   :  { %1732 = vmatpush.bf16.msrb.mxu0 %v2479_v63  ;;  %1746 = vmatpush.bf16.msrb.mxu1 %v2607_v0 }
 0x118   :  { %1706 = vmatpush.bf16.msra.mxu2 %v2191_v3  ;;  %1720 = vmatpush.bf16.msra.mxu3 %v2319_v4 }
 0x11a   :  { %1733 = vmatpush.bf16.msrb.mxu0 %v2463_v13  ;;  %1747 = vmatpush.bf16.msrb.mxu1 %v2591_v14 }
 0x11c   :  { %1707 = vmatpush.bf16.msra.mxu2 %v2175_v21  ;;  %1721 = vmatpush.bf16.msra.mxu3 %v2303_v22 }
 0x11e   :  { %1734 = vmatpush.bf16.msrb.mxu0 %v2447_v25  ;;  %1748 = vmatpush.bf16.msrb.mxu1 %v2575_v26 }
 0x120   :  { %1708 = vmatpush.bf16.msra.mxu2 %v2159_v34  ;;  %1722 = vmatpush.bf16.msra.mxu3 %v2287_v35 }
 0x122   :  { %1735 = vmatpush.bf16.msrb.mxu0 %v2431_v40  ;;  %1749 = vmatpush.bf16.msrb.mxu1 %v2559_v41 }
 0x124   :  { %1709 = vmatpush.bf16.msra.mxu2 %v2143_v48  ;;  %1723 = vmatpush.bf16.msra.mxu3 %v2271_v49 }
 0x126   :  { %1736 = vmatpush.bf16.msrb.mxu0 %v2415_v50  ;;  %1750 = vmatpush.bf16.msrb.mxu1 %v2543_v51 }
 0x127   :  { %1710 = vmatmul.bf16.vlgmr.msra.gmra.mxu2 %v2990_v37  ;;  %1724 = vmatmul.bf16.vlgmr.msra.gmra.mxu3 %v2992_v38 }
 0x129   :  { %v1431_v59 = vpop.f32.mrf.mxu2  ;;  %v1445_v60 = vpop.f32.mrf.mxu3 }
 0x12a   :  { %1737 = vmatpush.bf16.msrb.mxu0 %v2399_v55  ;;  %1751 = vmatpush.bf16.msrb.mxu1 %v2527_v56  ;;  %v1432_v61 = vadd.f32 %v1431_v59, %v454_v58  ;;  %v1459_v62 = vpop.f32.mrf.mxu0  ;;  %v1473_v63 = vpop.f32.mrf.mxu1  ;;  %v457_v55 = vperm.slane %v3021_v57, 3 }
 0x12c   :  { %v1446_v37 = vadd.f32 %v1445_v60, %v1432_v61 }
 0x12d   :  { %1738 = vmatmul.bf16.vlgmr.msrb.gmra.mxu0 %v2996_v11  ;;  %1752 = vmatmul.bf16.vlgmr.msrb.gmra.mxu1 %v2998_v12 }
 0x12e   :  { %v1460_v38 = vadd.f32 %v1459_v62, %v1446_v37 }
 0x130   :  { %v1474_v0 = vadd.f32 %v1473_v63, %v1460_v38 }
 0x131   :  { %v1433_v1 = vpop.f32.mrf.mxu2  ;;  %v1447_v2 = vpop.f32.mrf.mxu3 }
 0x132   :  { %v1434_v5 = vadd.f32 %v1433_v1, %v454_v58  ;;  %v1461_v7 = vpop.f32.mrf.mxu0  ;;  %v1475_v3 = vpop.f32.mrf.mxu1 }
 0x134   :  { %v1448_v6 = vadd.f32 %v1447_v2, %v1434_v5 }
 0x136   :  { %v1462_v8 = vadd.f32 %v1461_v7, %v1448_v6  ;;  %v1766_v7 = vld [vmem:[%s3049_s5] sm:$0xf] }
 0x137   :  { %v1769_v57 = vperm.slane %v1766_v7, 1 }
 0x138   :  { %v1476_v11 = vadd.f32 %v1475_v3, %v1462_v8 }
 0x13a   :  { %v1487_v4 = vpop.f32.mrf.mxu2  ;;  %v1501_v12 = vpop.f32.mrf.mxu3 }
 0x13b   :  { %v1488_v9 = vadd.f32 %v1487_v4, %v1474_v0  ;;  %v1515_v17 = vpop.f32.mrf.mxu0  ;;  %v1529_v18 = vpop.f32.mrf.mxu1 }
 0x13c   :  { %v1516_v42 = vadd.f32 %v1515_v17, %v455_v36 }
 0x13d   :  { %v3026_v10 = vadd.f32 %v1501_v12, %v1488_v9 }
 0x13e   :  { %v1530_v46 = vadd.f32 %v1529_v18, %v1516_v42  ;;  %v1770_v18 = vperm.slane %v1766_v7, 2 }
 0x142   :  { %v1489_v13 = vpop.f32.mrf.mxu2  ;;  %v1503_v15 = vpop.f32.mrf.mxu3 }
 0x143   :  { %v1490_v14 = vadd.f32 %v1489_v13, %v1476_v11  ;;  %v1517_v19 = vpop.f32.mrf.mxu0  ;;  %v1531_v20 = vpop.f32.mrf.mxu1 }
 0x144   :  { %v1518_v51 = vadd.f32 %v1517_v19, %v455_v36 }
 0x145   :  { %v3028_v16 = vadd.f32 %v1503_v15, %v1490_v14  ;;  %v1758_v14 = vmax.f32 %v3026_v10, 0.0  ;;  %v1768_v15 = vperm.slane %v1766_v7, 0 }
 0x146   :  { %v1532_v54 = vadd.f32 %v1531_v20, %v1518_v51 }
 0x14a   :  { %v1543_v21 = vpop.f32.mrf.mxu2  ;;  %v1557_v22 = vpop.f32.mrf.mxu3 }
 0x14b   :  { %v1571_v23 = vpop.f32.mrf.mxu0  ;;  %v1585_v24 = vpop.f32.mrf.mxu1  ;;  %v1544_v49 = vadd.f32 %v1543_v21, %v1530_v46 }
 0x14d   :  { %v1558_v52 = vadd.f32 %v1557_v22, %v1544_v49 }
 0x14f   :  { %v1572_v60 = vadd.f32 %v1571_v23, %v1558_v52 }
 0x151   :  { %v1586_v1 = vadd.f32 %v1585_v24, %v1572_v60 }
 0x152   :  { %v1545_v25 = vpop.f32.mrf.mxu2  ;;  %v1559_v26 = vpop.f32.mrf.mxu3 }
 0x153   :  { %v1573_v27 = vpop.f32.mrf.mxu0  ;;  %v1587_v28 = vpop.f32.mrf.mxu1  ;;  %v1546_v61 = vadd.f32 %v1545_v25, %v1532_v54  ;;  %v1759_v4 = vmax.f32 %v1586_v1, 0.0 }
 0x155   :  { %v1560_v2 = vadd.f32 %v1559_v26, %v1546_v61  ;;  %v1777_v24 = vmul.f32 %v1769_v57, %v1759_v4 }
 0x157   :  { %v1574_v12 = vadd.f32 %v1573_v27, %v1560_v2 }
 0x159   :  { %v1588_v25 = vadd.f32 %v1587_v28, %v1574_v12 }
 0x15b   :  { %v1763_v36 = vmax.f32 %v1588_v25, 0.0 }
 0x16a   :  { %v1599_v29 = vpop.f32.mrf.mxu2  ;;  %v1613_v30 = vpop.f32.mrf.mxu3 }
 0x16b   :  { %v1627_v32 = vpop.f32.mrf.mxu0  ;;  %v1641_v33 = vpop.f32.mrf.mxu1  ;;  %v1600_v43 = vadd.f32 %v1599_v29, %v456_v39  ;;  %v1776_v29 = vmul.f32 %v1768_v15, %v1758_v14 }
 0x16d   :  { %v1614_v47 = vadd.f32 %v1613_v30, %v1600_v43 }
 0x16f   :  { %v1628_v31 = vadd.f32 %v1627_v32, %v1614_v47  ;;  %v1781_v47 = vmul.f32 %v1769_v57, %v1763_v36 }
 0x171   :  { %v1642_v56 = vadd.f32 %v1641_v33, %v1628_v31 }
 0x172   :  { %v1601_v34 = vpop.f32.mrf.mxu2  ;;  %v1615_v35 = vpop.f32.mrf.mxu3 }
 0x173   :  { %v1629_v40 = vpop.f32.mrf.mxu0  ;;  %v1643_v41 = vpop.f32.mrf.mxu1  ;;  %v1602_v53 = vadd.f32 %v1601_v34, %v456_v39  ;;  %v1771_v34 = vperm.slane %v1766_v7, 3 }
 0x175   :  { %v1616_v62 = vadd.f32 %v1615_v35, %v1602_v53 }
 0x177   :  { %v1630_v5 = vadd.f32 %v1629_v40, %v1616_v62  ;;  %v1784_v40 = vadd.f32 %v1777_v24, %v1776_v29 }
 0x179   :  { %v1644_v9 = vadd.f32 %v1643_v41, %v1630_v5  ;;  %v1762_v41 = vmax.f32 %v3028_v16, 0.0  ;;  %v1795_v16 = vstv %s3050_s6 }
 0x17b   :  { %v1780_v51 = vmul.f32 %v1768_v15, %v1762_v41 }
 0x17d   :  { %v1789_v53 = vadd.f32 %v1781_v47, %v1780_v51 }
 0x18a   :  { %v1655_v44 = vpop.f32.mrf.mxu2  ;;  %v1669_v45 = vpop.f32.mrf.mxu3 }
 0x18b   :  { %v1683_v48 = vpop.f32.mrf.mxu0  ;;  %v1697_v50 = vpop.f32.mrf.mxu1  ;;  %v1656_v37 = vadd.f32 %v1655_v44, %v1642_v56 }
 0x18c   :  { %v1684_v38 = vadd.f32 %v1683_v48, %v457_v55 }
 0x18d   :  { %v1670_v6 = vadd.f32 %v1669_v45, %v1656_v37 }
 0x18e   :  { %v1698_v8 = vadd.f32 %v1697_v50, %v1684_v38 }
 0x18f   :  { %v1760_v17 = vmax.f32 %v1670_v6, 0.0 }
 0x191   :  { %v1778_v30 = vmul.f32 %v1770_v18, %v1760_v17 }
 0x192   :  { %v1657_v58 = vpop.f32.mrf.mxu2  ;;  %v1671_v59 = vpop.f32.mrf.mxu3 }
 0x193   :  { %v1685_v63 = vpop.f32.mrf.mxu0  ;;  %v1699_v0 = vpop.f32.mrf.mxu1  ;;  %v1658_v20 = vadd.f32 %v1657_v58, %v1644_v9  ;;  %v1785_v46 = vadd.f32 %v1784_v40, %v1778_v30 }
 0x194   :  { %v1686_v21 = vadd.f32 %v1685_v63, %v457_v55 }
 0x195   :  { %v1672_v32 = vadd.f32 %v1671_v59, %v1658_v20 }
 0x196   :  { %v1700_v33 = vadd.f32 %v1699_v0, %v1686_v21 }
 0x197   :  { %v1764_v43 = vmax.f32 %v1672_v32, 0.0 }
 0x199   :  { %v1782_v31 = vmul.f32 %v1770_v18, %v1764_v43 }
 0x19b   :  { %v1790_v56 = vadd.f32 %v1789_v53, %v1782_v31 }
 0x1aa   :  { %v1711_v3 = vpop.f32.mrf.mxu2  ;;  %v1725_v11 = vpop.f32.mrf.mxu3 }
 0x1ab   :  { %v1712_v13 = vadd.f32 %v1711_v3, %v1698_v8  ;;  %v1739_v19 = vpop.f32.mrf.mxu0  ;;  %v1753_v23 = vpop.f32.mrf.mxu1 }
 0x1ad   :  { %v1726_v22 = vadd.f32 %v1725_v11, %v1712_v13 }
 0x1af   :  { %v1740_v26 = vadd.f32 %v1739_v19, %v1726_v22 }
 0x1b1   :  { %v1754_v27 = vadd.f32 %v1753_v23, %v1740_v26 }
 0x1b2   :  { %v1713_v35 = vpop.f32.mrf.mxu2  ;;  %v1727_v42 = vpop.f32.mrf.mxu3 }
 0x1b3   :  { %v1761_v10 = vmax.f32 %v1754_v27, 0.0  ;;  %v1714_v39 = vadd.f32 %v1713_v35, %v1700_v33  ;;  %v1741_v28 = vpop.f32.mrf.mxu0  ;;  %v1755_v50 = vpop.f32.mrf.mxu1 }
 0x1b5   :  { %v1728_v44 = vadd.f32 %v1727_v42, %v1714_v39  ;;  %v1779_v45 = vmul.f32 %v1771_v34, %v1761_v10 }
 0x1b7   :  { %v1742_v48 = vadd.f32 %v1741_v28, %v1728_v44  ;;  %v1786_v49 = vadd.f32 %v1785_v46, %v1779_v45 }
 0x1b9   :  { %v1756_v52 = vadd.f32 %v1755_v50, %v1742_v48  ;;  %1787 = vadd.xlane.f32.xlu0 %v1786_v49 }
 0x1bb   :  { %v1765_v54 = vmax.f32 %v1756_v52, 0.0 }
 0x1bd   :  { %v1783_v55 = vmul.f32 %v1771_v34, %v1765_v54 }
 0x1bf   :  { %v1791_v58 = vadd.f32 %v1790_v56, %v1783_v55 }
 0x1c1   :  { %1792 = vadd.xlane.f32.xlu0 %v1791_v58 }
 0x22c   :  { %v1788_v59 = vpop.xlane.xlu0 %1787 }
 0x22d   :  { %v1796_v60 = vadd.f32 %v1795_v16, %v1788_v59 }
 0x22f   :  { %1798 = vxpose.xlu1.b32.start [1/2] (short) (narrow) %v1796_v60, 8 }
 0x234   :  { %v1793_v61 = vpop.xlane.xlu0 %1792 }
 0x235   :  { %v1797_v62 = vadd.f32 %v1795_v16, %v1793_v61 }
 0x237   :  { %1799 = vxpose.xlu1.b32.end [2/2] (short) (narrow) %v1797_v62, 8 }
 0x2d3   :  { %v1814_v37 = vpop.trf.xlu1 }
 0x2d4   :  { %1831 = vst.msk [vmem:[%s3051_s7] sm:$0x1] %vm1830_vm2, %v1814_v37 }
 0x2d5   :  { %1836 = vsyncpa [#allocation4], 1 }
 0x2d6   :  { %1837 = vsyncpa [#allocation6], 1 }

</bundles_post_ra>
